<compile_context>
chip_gen: v7x
topology: tpu7x:2x2x1
jax: 0.10.0
libtpu: 0.0.40
codegen_flags: <defaults>
</compile_context>

<pallas_src>
import functools
from math import sqrt

import jax
import jax.numpy as jnp
from jax import lax
from jax.experimental import pallas as pl
from jax.experimental.pallas import tpu as pltpu


def _ln(x, gamma, beta, eps):
    mean = jnp.mean(x, axis=-1, keepdims=True)
    var = jnp.mean((x - mean) ** 2, axis=-1, keepdims=True)
    return (x - mean) * lax.rsqrt(var + eps) * gamma + beta


# ------------------------- fused encoder kernel -------------------------
def fused_encoder_kernel(emb_ref, eg_ref, eb_ref,
                         g1_ref, be1_ref, wqkv_ref, bqkv_ref, wo_ref, bo_ref,
                         g2_ref, be2_ref, w1_ref, b1_ref, w2_ref, b2_ref,
                         out_ref, x_scr, *, n_heads, seq_len, batch_block,
                         tanh_gelu=False):
    l = pl.program_id(1)
    n_layers = pl.num_programs(1)

    # Embedding LayerNorm folded into the first layer iteration.
    # TODO(synk): emb_ref's (double-buffered) VMEM block is only read at l==0; a manual DMA from
    # memory_space=pl.ANY guarded by pl.when(l==0) would free that VMEM for the rest of the loop.
    @pl.when(l == 0)
    def _():
        x_scr[...] = _ln(emb_ref[...], eg_ref[...], eb_ref[...], 1e-12)

    x = x_scr[...]                       # (T, H) f32, T = batch_block * seq_len
    T, H = x.shape
    B, S = batch_block, seq_len
    d = H // n_heads
    scale = 1.0 / sqrt(d)

    # ---------------- multi-head self-attention (pre-LN) ----------------
    h = _ln(x, g1_ref[0], be1_ref[0], 1e-5)
    qkv = jnp.dot(h.astype(jnp.bfloat16), wqkv_ref[0],
                  preferred_element_type=jnp.float32) + bqkv_ref[0]    # (T, 3H)

    def split_heads(t):
        # (T, H) -> (B*nH, S, d); minor (lane) dim preserved by the transpose.
        t = t.reshape(B, S, n_heads, d)
        return jnp.swapaxes(t, 1, 2).reshape(B * n_heads, S, d)

    # 1/sqrt(d) folded into q (T*d multiply) instead of scaling the (B*nH,S,S) score tensor.
    q = split_heads(qkv[:, :H] * scale).astype(jnp.bfloat16)
    k = split_heads(qkv[:, H:2 * H]).astype(jnp.bfloat16)
    v = split_heads(qkv[:, 2 * H:]).astype(jnp.bfloat16)

    # Per-batch-element attention: no cross-batch scores, no mask needed.
    s = jnp.einsum("bqd,bkd->bqk", q, k,
                   preferred_element_type=jnp.float32)                 # (B*nH, S, S)
    m = jnp.max(s, axis=-1, keepdims=True)
    e = jnp.exp(s - m)
    w = e * pl.reciprocal(jnp.sum(e, axis=-1, keepdims=True), approx=True)
    o = jnp.einsum("bqk,bkd->bqd", w.astype(jnp.bfloat16), v,
                   preferred_element_type=jnp.float32)                 # (B*nH, S, d)

    attn = jnp.swapaxes(o.reshape(B, n_heads, S, d), 1, 2).reshape(T, H)
    attn = jnp.dot(attn.astype(jnp.bfloat16), wo_ref[0],
                   preferred_element_type=jnp.float32) + bo_ref[0]
    x1 = x + attn

    # ---------------- feed-forward (pre-LN) ----------------
    h2 = _ln(x1, g2_ref[0], be2_ref[0], 1e-5)
    f = jnp.dot(h2.astype(jnp.bfloat16), w1_ref[0],
                preferred_element_type=jnp.float32) + b1_ref[0]
    if tanh_gelu:
        # EUP-path approximation (deviates slightly from nn.GELU's exact default).
        f = 0.5 * f * (1.0 + jnp.tanh(0.7978845608028654 * (f + 0.044715 * f * f * f)))
    else:
        f = 0.5 * f * (1.0 + lax.erf(f * (1.0 / sqrt(2.0))))           # exact GELU (nn.GELU)
    f = jnp.dot(f.astype(jnp.bfloat16), w2_ref[0],
                preferred_element_type=jnp.float32) + b2_ref[0]
    x2 = x1 + f

    x_scr[...] = x2

    @pl.when(l == n_layers - 1)
    def _():
        out_ref[...] = x2


def transformer_encoder_forward(emb, emb_g, emb_b, stacked, *, n_heads, seq_len,
                                batch_block, vmem_limit_bytes=48 * 1024 * 1024,
                                tanh_gelu=False):
    # emb: (B*S, H) f32 = token_emb[ids] + pos_emb, flattened over tokens.
    BS, H = emb.shape
    T = batch_block * seq_len
    assert BS % T == 0
    NB = BS // T                 # v5e/v6e: push toward NB=1 (weights re-stream once per block);
    L = stacked["wqkv"].shape[0]  # v7x: prefer NB=2 so both TensorCores get a batch block.
    Dff = stacked["w1"].shape[-1]

    def wspec(*shape):   # per-layer stacked weight: block over the layer axis (double-buffered)
        return pl.BlockSpec((1,) + shape, lambda nb, l: (l, 0, 0))

    grid_spec = pltpu.PrefetchScalarGridSpec(
        num_scalar_prefetch=0,
        grid=(NB, L),
        in_specs=[
            pl.BlockSpec((T, H), lambda nb, l: (nb, 0)),   # embeddings (token+pos), flattened
            pl.BlockSpec((1, H), lambda nb, l: (0, 0)),    # emb LN gamma
            pl.BlockSpec((1, H), lambda nb, l: (0, 0)),    # emb LN beta
            wspec(1, H),        # g1
            wspec(1, H),        # be1
            wspec(H, 3 * H),    # wqkv (bf16)
            wspec(1, 3 * H),    # bqkv
            wspec(H, H),        # wo   (bf16)
            wspec(1, H),        # bo
            wspec(1, H),        # g2
            wspec(1, H),        # be2
            wspec(H, Dff),      # w1   (bf16)
            wspec(1, Dff),      # b1
            wspec(Dff, H),      # w2   (bf16)
            wspec(1, H),        # b2
        ],
        out_specs=pl.BlockSpec((T, H), lambda nb, l: (nb, 0)),
        scratch_shapes=[pltpu.VMEM((T, H), jnp.float32)],   # hidden-state carry across layers
    )
    return pl.pallas_call(
        functools.partial(fused_encoder_kernel, n_heads=n_heads, seq_len=seq_len,
                          batch_block=batch_block, tanh_gelu=tanh_gelu),
        out_shape=jax.ShapeDtypeStruct((BS, H), jnp.float32),
        grid_spec=grid_spec,
        compiler_params=pltpu.CompilerParams(
            dimension_semantics=("parallel", "arbitrary"),
            vmem_limit_bytes=vmem_limit_bytes),
    )(emb, emb_g, emb_b,
      stacked["g1"], stacked["be1"], stacked["wqkv"], stacked["bqkv"],
      stacked["wo"], stacked["bo"], stacked["g2"], stacked["be2"],
      stacked["w1"], stacked["b1"], stacked["w2"], stacked["b2"])


# ------------------------- deterministic parameter init -------------------------
def init_params(key, cfg):
    H, Dff, L = cfg["hidden_size"], cfg["hidden_dim"], cfg["num_hidden_layers"]
    ks = jax.random.split(key, 3)
    P = {
        "tok_emb": 0.02 * jax.random.normal(ks[0], (cfg["vocab_size"], H), jnp.float32),
        "pos_emb": 0.02 * jax.random.normal(ks[1], (cfg["max_position_embeddings"], H), jnp.float32),
        "emb_g": jnp.ones((1, H), jnp.float32),
        "emb_b": jnp.zeros((1, H), jnp.float32),
        "layers": [],
    }

    def lin(k, din, dout, scale=0.05):
        kw, kb = jax.random.split(k)
        return (scale * jax.random.normal(kw, (din, dout), jnp.float32),
                scale * jax.random.normal(kb, (1, dout), jnp.float32))

    lk = jax.random.split(ks[2], L)
    for i in range(L):
        kk = jax.random.split(lk[i], 6)
        wq, bq = lin(kk[0], H, H)
        wk, bk = lin(kk[1], H, H)
        wv, bv = lin(kk[2], H, H)
        wo, bo = lin(kk[3], H, H)
        w1, b1 = lin(kk[4], H, Dff)
        w2, b2 = lin(kk[5], Dff, H)
        P["layers"].append(dict(
            g1=jnp.ones((1, H)), be1=jnp.zeros((1, H)),
            g2=jnp.ones((1, H)), be2=jnp.zeros((1, H)),
            wq=wq, bq=bq, wk=wk, bk=bk, wv=wv, bv=bv,
            wo=wo, bo=bo, w1=w1, b1=b1, w2=w2, b2=b2))
    return P


def stack_layer_params(layers):
    """Stack per-layer params into (L, ...) arrays; fuse QKV; matmul weights in bf16."""
    def st(name):
        return jnp.stack([lp[name] for lp in layers], axis=0)
    wqkv = jnp.stack([jnp.concatenate([lp["wq"], lp["wk"], lp["wv"]], axis=1) for lp in layers], 0)
    bqkv = jnp.stack([jnp.concatenate([lp["bq"], lp["bk"], lp["bv"]], axis=1) for lp in layers], 0)
    return dict(
        g1=st("g1"), be1=st("be1"), g2=st("g2"), be2=st("be2"),
        wqkv=wqkv.astype(jnp.bfloat16), bqkv=bqkv,
        wo=st("wo").astype(jnp.bfloat16), bo=st("bo"),
        w1=st("w1").astype(jnp.bfloat16), b1=st("b1"),
        w2=st("w2").astype(jnp.bfloat16), b2=st("b2"))


# ------------------------- pure-JAX f32 reference -------------------------
def ref_forward(tok_ids, P, cfg):
    S = tok_ids.shape[1]
    H = cfg["hidden_size"]
    d = H // cfg["n_heads"]
    x = P["tok_emb"][tok_ids] + P["pos_emb"][:S][None]
    x = _ln(x, P["emb_g"], P["emb_b"], 1e-12)
    for lp in P["layers"]:
        h = _ln(x, lp["g1"], lp["be1"], 1e-5)
        Q = h @ lp["wq"] + lp["bq"]
        K = h @ lp["wk"] + lp["bk"]
        V = h @ lp["wv"] + lp["bv"]
        outs = []
        for i in range(cfg["n_heads"]):
            q, k, v = (A[..., i * d:(i + 1) * d] for A in (Q, K, V))
            s = jnp.einsum("bqd,bkd->bqk", q, k) * (1.0 / sqrt(d))
            w = jax.nn.softmax(s, axis=-1)
            outs.append(jnp.einsum("bqk,bkd->bqd", w, v))
        x = x + (jnp.concatenate(outs, -1) @ lp["wo"] + lp["bo"])
        h2 = _ln(x, lp["g2"], lp["be2"], 1e-5)
        f = h2 @ lp["w1"] + lp["b1"]
        f = 0.5 * f * (1.0 + lax.erf(f / sqrt(2.0)))
        x = x + (f @ lp["w2"] + lp["b2"])
    return x


if __name__ == "__main__":
    cfg = dict(vocab_size=50, hidden_size=32, max_position_embeddings=16,
               n_heads=4, hidden_dim=64, num_hidden_layers=2,
               seq_classif_dropout=0.1)
    B, S, H = 2, 8, 32

    key = jax.random.PRNGKey(0)
    kp, kx = jax.random.split(key)
    P = init_params(kp, cfg)
    tok_ids = jax.random.randint(kx, (B, S), 0, cfg["vocab_size"], dtype=jnp.int32)

    # TODO(synk): embedding-table gather stays in XLA glue (a PrefetchScalarGridSpec row-gather
    # would remove this (B,S,H) materialization); add + LN + all layers run in the fused kernel.
    emb = (P["tok_emb"][tok_ids] + P["pos_emb"][:S][None]).reshape(B * S, H)
    stacked = stack_layer_params(P["layers"])

    out = transformer_encoder_forward(emb, P["emb_g"], P["emb_b"], stacked,
                                      n_heads=cfg["n_heads"], seq_len=S, batch_block=B)
    out = jax.block_until_ready(out).reshape(B, S, H)

    ref = ref_forward(tok_ids, P, cfg)
    err = float(jnp.max(jnp.abs(out - ref)))
    # bf16 matmuls + approx reciprocal vs. f32 reference -> loosened tolerance.
    assert jnp.allclose(out, ref, atol=3e-2, rtol=3e-2), err
    print("KERNEL_OK")
</pallas_src>

<mosaic_0001>
module attributes {stable_mosaic.version = 11 : i64} {
  func.func @fused_encoder_kernel(%arg0: i32, %arg1: i32, %arg2: memref<16x32xf32, #tpu.memory_space<vmem>>, %arg3: memref<1x32xf32, #tpu.memory_space<vmem>>, %arg4: memref<1x32xf32, #tpu.memory_space<vmem>>, %arg5: memref<1x1x32xf32, #tpu.memory_space<vmem>>, %arg6: memref<1x1x32xf32, #tpu.memory_space<vmem>>, %arg7: memref<1x32x96xbf16, #tpu.memory_space<vmem>>, %arg8: memref<1x1x96xf32, #tpu.memory_space<vmem>>, %arg9: memref<1x32x32xbf16, #tpu.memory_space<vmem>>, %arg10: memref<1x1x32xf32, #tpu.memory_space<vmem>>, %arg11: memref<1x1x32xf32, #tpu.memory_space<vmem>>, %arg12: memref<1x1x32xf32, #tpu.memory_space<vmem>>, %arg13: memref<1x32x64xbf16, #tpu.memory_space<vmem>>, %arg14: memref<1x1x64xf32, #tpu.memory_space<vmem>>, %arg15: memref<1x64x32xbf16, #tpu.memory_space<vmem>>, %arg16: memref<1x1x32xf32, #tpu.memory_space<vmem>>, %arg17: memref<16x32xf32, #tpu.memory_space<vmem>>, %arg18: memref<16x32xf32, #tpu.memory_space<vmem>>) attributes {dimension_semantics = [#tpu.dimension_semantics<parallel>, #tpu.dimension_semantics<arbitrary>], iteration_bounds = array<i64: 1, 2>, scalar_prefetch = 0 : i64, scratch_operands = 1 : i64, tpu.core_type = #tpu.core_type<tc>, window_params = [{transform_indices = @transform_0, window_bounds = array<i64: 16, 32>}, {pipeline_mode = #tpu.pipeline_mode<synchronous>, transform_indices = @transform_1, window_bounds = array<i64: 1, 32>}, {pipeline_mode = #tpu.pipeline_mode<synchronous>, transform_indices = @transform_2, window_bounds = array<i64: 1, 32>}, {transform_indices = @transform_3, window_bounds = array<i64: 1, 1, 32>}, {transform_indices = @transform_4, window_bounds = array<i64: 1, 1, 32>}, {transform_indices = @transform_5, window_bounds = array<i64: 1, 32, 96>}, {transform_indices = @transform_6, window_bounds = array<i64: 1, 1, 96>}, {transform_indices = @transform_7, window_bounds = array<i64: 1, 32, 32>}, {transform_indices = @transform_8, window_bounds = array<i64: 1, 1, 32>}, {transform_indices = @transform_9, window_bounds = array<i64: 1, 1, 32>}, {transform_indices = @transform_10, window_bounds = array<i64: 1, 1, 32>}, {transform_indices = @transform_11, window_bounds = array<i64: 1, 32, 64>}, {transform_indices = @transform_12, window_bounds = array<i64: 1, 1, 64>}, {transform_indices = @transform_13, window_bounds = array<i64: 1, 64, 32>}, {transform_indices = @transform_14, window_bounds = array<i64: 1, 1, 32>}, {transform_indices = @transform_15, window_bounds = array<i64: 16, 32>}]} {
    %c0_i32 = arith.constant 0 : i32
    %0 = arith.cmpi eq, %arg1, %c0_i32 : i32
    %1 = arith.extui %0 : i1 to i32
    %c0_i32_0 = arith.constant 0 : i32
    %2 = arith.cmpi ne, %1, %c0_i32_0 : i32
    scf.if %2 {
      %c0_62 = arith.constant 0 : index
      %c0_63 = arith.constant 0 : index
      %135 = vector.load %arg2[%c0_62, %c0_63] : memref<16x32xf32, #tpu.memory_space<vmem>>, vector<16x32xf32>
      %c0_64 = arith.constant 0 : index
      %c0_65 = arith.constant 0 : index
      %136 = vector.load %arg3[%c0_64, %c0_65] : memref<1x32xf32, #tpu.memory_space<vmem>>, vector<1x32xf32>
      %c0_66 = arith.constant 0 : index
      %c0_67 = arith.constant 0 : index
      %137 = vector.load %arg4[%c0_66, %c0_67] : memref<1x32xf32, #tpu.memory_space<vmem>>, vector<1x32xf32>
      %cst_68 = arith.constant dense<0.000000e+00> : vector<16xf32>
      %138 = vector.multi_reduction <add>, %135, %cst_68 [1] : vector<16x32xf32> to vector<16xf32>
      %139 = vector.shape_cast %138 : vector<16xf32> to vector<16x1xf32>
      %cst_69 = arith.constant 3.200000e+01 : f32
      %140 = vector.broadcast %cst_69 : f32 to vector<16x1xf32>
      %141 = arith.divf %139, %140 : vector<16x1xf32>
      %142 = vector.broadcast %141 : vector<16x1xf32> to vector<16x32xf32>
      %143 = arith.subf %135, %142 : vector<16x32xf32>
      %144 = arith.mulf %143, %143 : vector<16x32xf32>
      %cst_70 = arith.constant dense<0.000000e+00> : vector<16xf32>
      %145 = vector.multi_reduction <add>, %144, %cst_70 [1] : vector<16x32xf32> to vector<16xf32>
      %146 = vector.shape_cast %145 : vector<16xf32> to vector<16x1xf32>
      %cst_71 = arith.constant 3.200000e+01 : f32
      %147 = vector.broadcast %cst_71 : f32 to vector<16x1xf32>
      %148 = arith.divf %146, %147 : vector<16x1xf32>
      %149 = vector.broadcast %141 : vector<16x1xf32> to vector<16x32xf32>
      %150 = arith.subf %135, %149 : vector<16x32xf32>
      %cst_72 = arith.constant 9.99999996E-13 : f32
      %151 = vector.broadcast %cst_72 : f32 to vector<16x1xf32>
      %152 = arith.addf %148, %151 : vector<16x1xf32>
      %153 = math.rsqrt %152 : vector<16x1xf32>
      %154 = vector.broadcast %153 : vector<16x1xf32> to vector<16x32xf32>
      %155 = arith.mulf %150, %154 : vector<16x32xf32>
      %156 = vector.broadcast %136 : vector<1x32xf32> to vector<16x32xf32>
      %157 = arith.mulf %155, %156 : vector<16x32xf32>
      %158 = vector.broadcast %137 : vector<1x32xf32> to vector<16x32xf32>
      %159 = arith.addf %157, %158 : vector<16x32xf32>
      %c0_73 = arith.constant 0 : index
      %c0_74 = arith.constant 0 : index
      %160 = vector.load %arg18[%c0_73, %c0_74] : memref<16x32xf32, #tpu.memory_space<vmem>>, vector<16x32xf32>
      tpu.vector_store %arg18[%c0_73, %c0_74], %159 {strides = array<i32>} : memref<16x32xf32, #tpu.memory_space<vmem>>, vector<16x32xf32>,
    } else {
    }
    %c0 = arith.constant 0 : index
    %c0_1 = arith.constant 0 : index
    %3 = vector.load %arg18[%c0, %c0_1] : memref<16x32xf32, #tpu.memory_space<vmem>>, vector<16x32xf32>
    %c0_2 = arith.constant 0 : index
    %c0_3 = arith.constant 0 : index
    %c0_4 = arith.constant 0 : index
    %4 = vector.load %arg5[%c0_2, %c0_3, %c0_4] : memref<1x1x32xf32, #tpu.memory_space<vmem>>, vector<1x1x32xf32>
    %5 = vector.shape_cast %4 : vector<1x1x32xf32> to vector<1x32xf32>
    %c0_5 = arith.constant 0 : index
    %c0_6 = arith.constant 0 : index
    %c0_7 = arith.constant 0 : index
    %6 = vector.load %arg6[%c0_5, %c0_6, %c0_7] : memref<1x1x32xf32, #tpu.memory_space<vmem>>, vector<1x1x32xf32>
    %7 = vector.shape_cast %6 : vector<1x1x32xf32> to vector<1x32xf32>
    %cst = arith.constant dense<0.000000e+00> : vector<16xf32>
    %8 = vector.multi_reduction <add>, %3, %cst [1] : vector<16x32xf32> to vector<16xf32>
    %9 = vector.shape_cast %8 : vector<16xf32> to vector<16x1xf32>
    %cst_8 = arith.constant 3.200000e+01 : f32
    %10 = vector.broadcast %cst_8 : f32 to vector<16x1xf32>
    %11 = arith.divf %9, %10 : vector<16x1xf32>
    %12 = vector.broadcast %11 : vector<16x1xf32> to vector<16x32xf32>
    %13 = arith.subf %3, %12 : vector<16x32xf32>
    %14 = arith.mulf %13, %13 : vector<16x32xf32>
    %cst_9 = arith.constant dense<0.000000e+00> : vector<16xf32>
    %15 = vector.multi_reduction <add>, %14, %cst_9 [1] : vector<16x32xf32> to vector<16xf32>
    %16 = vector.shape_cast %15 : vector<16xf32> to vector<16x1xf32>
    %cst_10 = arith.constant 3.200000e+01 : f32
    %17 = vector.broadcast %cst_10 : f32 to vector<16x1xf32>
    %18 = arith.divf %16, %17 : vector<16x1xf32>
    %19 = vector.broadcast %11 : vector<16x1xf32> to vector<16x32xf32>
    %20 = arith.subf %3, %19 : vector<16x32xf32>
    %cst_11 = arith.constant 9.99999974E-6 : f32
    %21 = vector.broadcast %cst_11 : f32 to vector<16x1xf32>
    %22 = arith.addf %18, %21 : vector<16x1xf32>
    %23 = math.rsqrt %22 : vector<16x1xf32>
    %24 = vector.broadcast %23 : vector<16x1xf32> to vector<16x32xf32>
    %25 = arith.mulf %20, %24 : vector<16x32xf32>
    %26 = vector.broadcast %5 : vector<1x32xf32> to vector<16x32xf32>
    %27 = arith.mulf %25, %26 : vector<16x32xf32>
    %28 = vector.broadcast %7 : vector<1x32xf32> to vector<16x32xf32>
    %29 = arith.addf %27, %28 : vector<16x32xf32>
    %30 = arith.truncf %29 : vector<16x32xf32> to vector<16x32xbf16>
    %c0_12 = arith.constant 0 : index
    %c0_13 = arith.constant 0 : index
    %c0_14 = arith.constant 0 : index
    %31 = vector.load %arg7[%c0_12, %c0_13, %c0_14] : memref<1x32x96xbf16, #tpu.memory_space<vmem>>, vector<1x32x96xbf16>
    %32 = vector.shape_cast %31 : vector<1x32x96xbf16> to vector<32x96xbf16>
    %cst_15 = arith.constant dense<0.000000e+00> : vector<16x96xf32>
    %33 = tpu.matmul %30, %32, %cst_15 {dimension_numbers = #tpu.dot_dimension_numbers<[1], [0], [0], [1], [0, 0, 1, 1], [], []>} : vector<16x32xbf16>, vector<32x96xbf16>, vector<16x96xf32> -> vector<16x96xf32>
    %c0_16 = arith.constant 0 : index
    %c0_17 = arith.constant 0 : index
    %c0_18 = arith.constant 0 : index
    %34 = vector.load %arg8[%c0_16, %c0_17, %c0_18] : memref<1x1x96xf32, #tpu.memory_space<vmem>>, vector<1x1x96xf32>
    %35 = vector.shape_cast %34 : vector<1x1x96xf32> to vector<1x96xf32>
    %36 = vector.broadcast %35 : vector<1x96xf32> to vector<16x96xf32>
    %37 = arith.addf %33, %36 : vector<16x96xf32>
    %38 = vector.extract_strided_slice %37 {offsets = [0, 0], sizes = [16, 32], strides = [1, 1]} : vector<16x96xf32> to vector<16x32xf32>
    %cst_19 = arith.constant 0.353553385 : f32
    %39 = vector.broadcast %cst_19 : f32 to vector<16x32xf32>
    %40 = arith.mulf %38, %39 : vector<16x32xf32>
    %41 = vector.shape_cast %40 : vector<16x32xf32> to vector<2x8x4x8xf32>
    %42 = tpu.transpose %41, [0, 2, 1, 3] : vector<2x8x4x8xf32> -> vector<2x4x8x8xf32>
    %43 = vector.shape_cast %42 : vector<2x4x8x8xf32> to vector<8x8x8xf32>
    %44 = arith.truncf %43 : vector<8x8x8xf32> to vector<8x8x8xbf16>
    %45 = vector.extract_strided_slice %37 {offsets = [0, 32], sizes = [16, 32], strides = [1, 1]} : vector<16x96xf32> to vector<16x32xf32>
    %46 = vector.shape_cast %45 : vector<16x32xf32> to vector<2x8x4x8xf32>
    %47 = tpu.transpose %46, [0, 2, 1, 3] : vector<2x8x4x8xf32> -> vector<2x4x8x8xf32>
    %48 = vector.shape_cast %47 : vector<2x4x8x8xf32> to vector<8x8x8xf32>
    %49 = arith.truncf %48 : vector<8x8x8xf32> to vector<8x8x8xbf16>
    %50 = vector.extract_strided_slice %37 {offsets = [0, 64], sizes = [16, 32], strides = [1, 1]} : vector<16x96xf32> to vector<16x32xf32>
    %51 = vector.shape_cast %50 : vector<16x32xf32> to vector<2x8x4x8xf32>
    %52 = tpu.transpose %51, [0, 2, 1, 3] : vector<2x8x4x8xf32> -> vector<2x4x8x8xf32>
    %53 = vector.shape_cast %52 : vector<2x4x8x8xf32> to vector<8x8x8xf32>
    %54 = arith.truncf %53 : vector<8x8x8xf32> to vector<8x8x8xbf16>
    "tpu.trace_start"() <{level = 10 : i32, message = "bqd,bkd->bqk"}> : () -> ()
    %cst_20 = arith.constant dense<0.000000e+00> : vector<8x8x8xf32>
    %55 = tpu.matmul %44, %49, %cst_20 {dimension_numbers = #tpu.dot_dimension_numbers<[2], [2], [1], [1], [0, 0, 0, 1, 1, 1], [0], [0]>} : vector<8x8x8xbf16>, vector<8x8x8xbf16>, vector<8x8x8xf32> -> vector<8x8x8xf32>
    "tpu.trace_stop"() : () -> ()
    %cst_21 = arith.constant dense<0xFF800000> : vector<8x8xf32>
    %56 = vector.multi_reduction <maximumf>, %55, %cst_21 [2] : vector<8x8x8xf32> to vector<8x8xf32>
    %57 = vector.shape_cast %56 : vector<8x8xf32> to vector<8x8x1xf32>
    %58 = vector.broadcast %57 : vector<8x8x1xf32> to vector<8x8x8xf32>
    %59 = arith.subf %55, %58 : vector<8x8x8xf32>
    %60 = math.exp %59 : vector<8x8x8xf32>
    %cst_22 = arith.constant dense<0.000000e+00> : vector<8x8xf32>
    %61 = vector.multi_reduction <add>, %60, %cst_22 [2] : vector<8x8x8xf32> to vector<8x8xf32>
    %62 = vector.shape_cast %61 : vector<8x8xf32> to vector<8x8x1xf32>
    %63 = tpu.reciprocal %62 {approx = true} : vector<8x8x1xf32> -> vector<8x8x1xf32>
    %64 = vector.broadcast %63 : vector<8x8x1xf32> to vector<8x8x8xf32>
    %65 = arith.mulf %60, %64 : vector<8x8x8xf32>
    %66 = arith.truncf %65 : vector<8x8x8xf32> to vector<8x8x8xbf16>
    "tpu.trace_start"() <{level = 10 : i32, message = "bqk,bkd->bqd"}> : () -> ()
    %cst_23 = arith.constant dense<0.000000e+00> : vector<8x8x8xf32>
    %67 = tpu.matmul %66, %54, %cst_23 {dimension_numbers = #tpu.dot_dimension_numbers<[2], [1], [1], [2], [0, 0, 0, 1, 1, 2], [0], [0]>} : vector<8x8x8xbf16>, vector<8x8x8xbf16>, vector<8x8x8xf32> -> vector<8x8x8xf32>
    "tpu.trace_stop"() : () -> ()
    %68 = vector.shape_cast %67 : vector<8x8x8xf32> to vector<2x4x8x8xf32>
    %69 = tpu.transpose %68, [0, 2, 1, 3] : vector<2x4x8x8xf32> -> vector<2x8x4x8xf32>
    %70 = vector.shape_cast %69 : vector<2x8x4x8xf32> to vector<16x32xf32>
    %71 = arith.truncf %70 : vector<16x32xf32> to vector<16x32xbf16>
    %c0_24 = arith.constant 0 : index
    %c0_25 = arith.constant 0 : index
    %c0_26 = arith.constant 0 : index
    %72 = vector.load %arg9[%c0_24, %c0_25, %c0_26] : memref<1x32x32xbf16, #tpu.memory_space<vmem>>, vector<1x32x32xbf16>
    %73 = vector.shape_cast %72 : vector<1x32x32xbf16> to vector<32x32xbf16>
    %cst_27 = arith.constant dense<0.000000e+00> : vector<16x32xf32>
    %74 = tpu.matmul %71, %73, %cst_27 {dimension_numbers = #tpu.dot_dimension_numbers<[1], [0], [0], [1], [0, 0, 1, 1], [], []>} : vector<16x32xbf16>, vector<32x32xbf16>, vector<16x32xf32> -> vector<16x32xf32>
    %c0_28 = arith.constant 0 : index
    %c0_29 = arith.constant 0 : index
    %c0_30 = arith.constant 0 : index
    %75 = vector.load %arg10[%c0_28, %c0_29, %c0_30] : memref<1x1x32xf32, #tpu.memory_space<vmem>>, vector<1x1x32xf32>
    %76 = vector.shape_cast %75 : vector<1x1x32xf32> to vector<1x32xf32>
    %77 = vector.broadcast %76 : vector<1x32xf32> to vector<16x32xf32>
    %78 = arith.addf %74, %77 : vector<16x32xf32>
    %79 = arith.addf %3, %78 : vector<16x32xf32>
    %c0_31 = arith.constant 0 : index
    %c0_32 = arith.constant 0 : index
    %c0_33 = arith.constant 0 : index
    %80 = vector.load %arg11[%c0_31, %c0_32, %c0_33] : memref<1x1x32xf32, #tpu.memory_space<vmem>>, vector<1x1x32xf32>
    %81 = vector.shape_cast %80 : vector<1x1x32xf32> to vector<1x32xf32>
    %c0_34 = arith.constant 0 : index
    %c0_35 = arith.constant 0 : index
    %c0_36 = arith.constant 0 : index
    %82 = vector.load %arg12[%c0_34, %c0_35, %c0_36] : memref<1x1x32xf32, #tpu.memory_space<vmem>>, vector<1x1x32xf32>
    %83 = vector.shape_cast %82 : vector<1x1x32xf32> to vector<1x32xf32>
    %cst_37 = arith.constant dense<0.000000e+00> : vector<16xf32>
    %84 = vector.multi_reduction <add>, %79, %cst_37 [1] : vector<16x32xf32> to vector<16xf32>
    %85 = vector.shape_cast %84 : vector<16xf32> to vector<16x1xf32>
    %cst_38 = arith.constant 3.200000e+01 : f32
    %86 = vector.broadcast %cst_38 : f32 to vector<16x1xf32>
    %87 = arith.divf %85, %86 : vector<16x1xf32>
    %88 = vector.broadcast %87 : vector<16x1xf32> to vector<16x32xf32>
    %89 = arith.subf %79, %88 : vector<16x32xf32>
    %90 = arith.mulf %89, %89 : vector<16x32xf32>
    %cst_39 = arith.constant dense<0.000000e+00> : vector<16xf32>
    %91 = vector.multi_reduction <add>, %90, %cst_39 [1] : vector<16x32xf32> to vector<16xf32>
    %92 = vector.shape_cast %91 : vector<16xf32> to vector<16x1xf32>
    %cst_40 = arith.constant 3.200000e+01 : f32
    %93 = vector.broadcast %cst_40 : f32 to vector<16x1xf32>
    %94 = arith.divf %92, %93 : vector<16x1xf32>
    %95 = vector.broadcast %87 : vector<16x1xf32> to vector<16x32xf32>
    %96 = arith.subf %79, %95 : vector<16x32xf32>
    %cst_41 = arith.constant 9.99999974E-6 : f32
    %97 = vector.broadcast %cst_41 : f32 to vector<16x1xf32>
    %98 = arith.addf %94, %97 : vector<16x1xf32>
    %99 = math.rsqrt %98 : vector<16x1xf32>
    %100 = vector.broadcast %99 : vector<16x1xf32> to vector<16x32xf32>
    %101 = arith.mulf %96, %100 : vector<16x32xf32>
    %102 = vector.broadcast %81 : vector<1x32xf32> to vector<16x32xf32>
    %103 = arith.mulf %101, %102 : vector<16x32xf32>
    %104 = vector.broadcast %83 : vector<1x32xf32> to vector<16x32xf32>
    %105 = arith.addf %103, %104 : vector<16x32xf32>
    %106 = arith.truncf %105 : vector<16x32xf32> to vector<16x32xbf16>
    %c0_42 = arith.constant 0 : index
    %c0_43 = arith.constant 0 : index
    %c0_44 = arith.constant 0 : index
    %107 = vector.load %arg13[%c0_42, %c0_43, %c0_44] : memref<1x32x64xbf16, #tpu.memory_space<vmem>>, vector<1x32x64xbf16>
    %108 = vector.shape_cast %107 : vector<1x32x64xbf16> to vector<32x64xbf16>
    %cst_45 = arith.constant dense<0.000000e+00> : vector<16x64xf32>
    %109 = tpu.matmul %106, %108, %cst_45 {dimension_numbers = #tpu.dot_dimension_numbers<[1], [0], [0], [1], [0, 0, 1, 1], [], []>} : vector<16x32xbf16>, vector<32x64xbf16>, vector<16x64xf32> -> vector<16x64xf32>
    %c0_46 = arith.constant 0 : index
    %c0_47 = arith.constant 0 : index
    %c0_48 = arith.constant 0 : index
    %110 = vector.load %arg14[%c0_46, %c0_47, %c0_48] : memref<1x1x64xf32, #tpu.memory_space<vmem>>, vector<1x1x64xf32>
    %111 = vector.shape_cast %110 : vector<1x1x64xf32> to vector<1x64xf32>
    %112 = vector.broadcast %111 : vector<1x64xf32> to vector<16x64xf32>
    %113 = arith.addf %109, %112 : vector<16x64xf32>
    %cst_49 = arith.constant 5.000000e-01 : f32
    %114 = vector.broadcast %cst_49 : f32 to vector<16x64xf32>
    %115 = arith.mulf %114, %113 : vector<16x64xf32>
    %cst_50 = arith.constant 0.707106769 : f32
    %116 = vector.broadcast %cst_50 : f32 to vector<16x64xf32>
    %117 = arith.mulf %113, %116 : vector<16x64xf32>
    %118 = math.erf %117 : vector<16x64xf32>
    %cst_51 = arith.constant 1.000000e+00 : f32
    %119 = vector.broadcast %cst_51 : f32 to vector<16x64xf32>
    %120 = arith.addf %119, %118 : vector<16x64xf32>
    %121 = arith.mulf %115, %120 : vector<16x64xf32>
    %122 = arith.truncf %121 : vector<16x64xf32> to vector<16x64xbf16>
    %c0_52 = arith.constant 0 : index
    %c0_53 = arith.constant 0 : index
    %c0_54 = arith.constant 0 : index
    %123 = vector.load %arg15[%c0_52, %c0_53, %c0_54] : memref<1x64x32xbf16, #tpu.memory_space<vmem>>, vector<1x64x32xbf16>
    %124 = vector.shape_cast %123 : vector<1x64x32xbf16> to vector<64x32xbf16>
    %cst_55 = arith.constant dense<0.000000e+00> : vector<16x32xf32>
    %125 = tpu.matmul %122, %124, %cst_55 {dimension_numbers = #tpu.dot_dimension_numbers<[1], [0], [0], [1], [0, 0, 1, 1], [], []>} : vector<16x64xbf16>, vector<64x32xbf16>, vector<16x32xf32> -> vector<16x32xf32>
    %c0_56 = arith.constant 0 : index
    %c0_57 = arith.constant 0 : index
    %c0_58 = arith.constant 0 : index
    %126 = vector.load %arg16[%c0_56, %c0_57, %c0_58] : memref<1x1x32xf32, #tpu.memory_space<vmem>>, vector<1x1x32xf32>
    %127 = vector.shape_cast %126 : vector<1x1x32xf32> to vector<1x32xf32>
    %128 = vector.broadcast %127 : vector<1x32xf32> to vector<16x32xf32>
    %129 = arith.addf %125, %128 : vector<16x32xf32>
    %130 = arith.addf %79, %129 : vector<16x32xf32>
    %c0_59 = arith.constant 0 : index
    %c0_60 = arith.constant 0 : index
    %131 = vector.load %arg18[%c0_59, %c0_60] : memref<16x32xf32, #tpu.memory_space<vmem>>, vector<16x32xf32>
    tpu.vector_store %arg18[%c0_59, %c0_60], %130 {strides = array<i32>} : memref<16x32xf32, #tpu.memory_space<vmem>>, vector<16x32xf32>,
    %c1_i32 = arith.constant 1 : i32
    %132 = arith.cmpi eq, %arg1, %c1_i32 : i32
    %133 = arith.extui %132 : i1 to i32
    %c0_i32_61 = arith.constant 0 : i32
    %134 = arith.cmpi ne, %133, %c0_i32_61 : i32
    scf.if %134 {
      %c0_62 = arith.constant 0 : index
      %c0_63 = arith.constant 0 : index
      %135 = vector.load %arg17[%c0_62, %c0_63] : memref<16x32xf32, #tpu.memory_space<vmem>>, vector<16x32xf32>
      tpu.vector_store %arg17[%c0_62, %c0_63], %130 {strides = array<i32>} : memref<16x32xf32, #tpu.memory_space<vmem>>, vector<16x32xf32>,
    } else {
    }
    return
  }
  func.func @transform_0(%arg0: i32, %arg1: i32) -> (i32, i32) {
    %c0_i32 = arith.constant 0 : i32
    %c0_i32_0 = arith.constant 0 : i32
    return %arg0, %c0_i32 : i32, i32
  }
  func.func @transform_1(%arg0: i32, %arg1: i32) -> (i32, i32) {
    %c0_i32 = arith.constant 0 : i32
    %c0_i32_0 = arith.constant 0 : i32
    %c0_i32_1 = arith.constant 0 : i32
    return %c0_i32, %c0_i32_0 : i32, i32
  }
  func.func @transform_2(%arg0: i32, %arg1: i32) -> (i32, i32) {
    %c0_i32 = arith.constant 0 : i32
    %c0_i32_0 = arith.constant 0 : i32
    %c0_i32_1 = arith.constant 0 : i32
    return %c0_i32, %c0_i32_0 : i32, i32
  }
  func.func @transform_3(%arg0: i32, %arg1: i32) -> (i32, i32, i32) {
    %c0_i32 = arith.constant 0 : i32
    %c0_i32_0 = arith.constant 0 : i32
    %c0_i32_1 = arith.constant 0 : i32
    return %arg1, %c0_i32, %c0_i32_0 : i32, i32, i32
  }
  func.func @transform_4(%arg0: i32, %arg1: i32) -> (i32, i32, i32) {
    %c0_i32 = arith.constant 0 : i32
    %c0_i32_0 = arith.constant 0 : i32
    %c0_i32_1 = arith.constant 0 : i32
    return %arg1, %c0_i32, %c0_i32_0 : i32, i32, i32
  }
  func.func @transform_5(%arg0: i32, %arg1: i32) -> (i32, i32, i32) {
    %c0_i32 = arith.constant 0 : i32
    %c0_i32_0 = arith.constant 0 : i32
    %c0_i32_1 = arith.constant 0 : i32
    return %arg1, %c0_i32, %c0_i32_0 : i32, i32, i32
  }
  func.func @transform_6(%arg0: i32, %arg1: i32) -> (i32, i32, i32) {
    %c0_i32 = arith.constant 0 : i32
    %c0_i32_0 = arith.constant 0 : i32
    %c0_i32_1 = arith.constant 0 : i32
    return %arg1, %c0_i32, %c0_i32_0 : i32, i32, i32
  }
  func.func @transform_7(%arg0: i32, %arg1: i32) -> (i32, i32, i32) {
    %c0_i32 = arith.constant 0 : i32
    %c0_i32_0 = arith.constant 0 : i32
    %c0_i32_1 = arith.constant 0 : i32
    return %arg1, %c0_i32, %c0_i32_0 : i32, i32, i32
  }
  func.func @transform_8(%arg0: i32, %arg1: i32) -> (i32, i32, i32) {
    %c0_i32 = arith.constant 0 : i32
    %c0_i32_0 = arith.constant 0 : i32
    %c0_i32_1 = arith.constant 0 : i32
    return %arg1, %c0_i32, %c0_i32_0 : i32, i32, i32
  }
  func.func @transform_9(%arg0: i32, %arg1: i32) -> (i32, i32, i32) {
    %c0_i32 = arith.constant 0 : i32
    %c0_i32_0 = arith.constant 0 : i32
    %c0_i32_1 = arith.constant 0 : i32
    return %arg1, %c0_i32, %c0_i32_0 : i32, i32, i32
  }
  func.func @transform_10(%arg0: i32, %arg1: i32) -> (i32, i32, i32) {
    %c0_i32 = arith.constant 0 : i32
    %c0_i32_0 = arith.constant 0 : i32
    %c0_i32_1 = arith.constant 0 : i32
    return %arg1, %c0_i32, %c0_i32_0 : i32, i32, i32
  }
  func.func @transform_11(%arg0: i32, %arg1: i32) -> (i32, i32, i32) {
    %c0_i32 = arith.constant 0 : i32
    %c0_i32_0 = arith.constant 0 : i32
    %c0_i32_1 = arith.constant 0 : i32
    return %arg1, %c0_i32, %c0_i32_0 : i32, i32, i32
  }
  func.func @transform_12(%arg0: i32, %arg1: i32) -> (i32, i32, i32) {
    %c0_i32 = arith.constant 0 : i32
    %c0_i32_0 = arith.constant 0 : i32
    %c0_i32_1 = arith.constant 0 : i32
    return %arg1, %c0_i32, %c0_i32_0 : i32, i32, i32
  }
  func.func @transform_13(%arg0: i32, %arg1: i32) -> (i32, i32, i32) {
    %c0_i32 = arith.constant 0 : i32
    %c0_i32_0 = arith.constant 0 : i32
    %c0_i32_1 = arith.constant 0 : i32
    return %arg1, %c0_i32, %c0_i32_0 : i32, i32, i32
  }
  func.func @transform_14(%arg0: i32, %arg1: i32) -> (i32, i32, i32) {
    %c0_i32 = arith.constant 0 : i32
    %c0_i32_0 = arith.constant 0 : i32
    %c0_i32_1 = arith.constant 0 : i32
    return %arg1, %c0_i32, %c0_i32_0 : i32, i32, i32
  }
  func.func @transform_15(%arg0: i32, %arg1: i32) -> (i32, i32) {
    %c0_i32 = arith.constant 0 : i32
    %c0_i32_0 = arith.constant 0 : i32
    return %arg0, %c0_i32 : i32, i32
  }
}

</mosaic_0001>

<bundles_post_ra>
// kernel: tpu_custom_call.1
= control target key start
LH: loop header
LB: loop body
LE: loop exit
PB: predicated region body
PF: predicated region fallthrough
CT: control target
= control target key end

     0   :  { %s4728_s0 = inlined_call_operand.hbm [shape: f32[16,32], index: 0, kind: input, shape index: {}]   ;;  %s4729_s1 = inlined_call_operand.vmem [shape: f32[1,32], index: 1, kind: input, shape index: {}]   ;;  %s4730_s2 = inlined_call_operand.hbm [shape: f32[1,32], index: 2, kind: input, shape index: {}]   ;;  %s4731_s3 = inlined_call_operand.vmem [shape: f32[2,1,32], index: 3, kind: input, shape index: {}]   ;;  %s4732_s4 = inlined_call_operand.vmem [shape: f32[2,1,32], index: 4, kind: input, shape index: {}]   ;;  %s4733_s5 = inlined_call_operand.vmem [shape: bf16[2,32,96], index: 5, kind: input, shape index: {}]   ;;  %s4734_s6 = inlined_call_operand.vmem [shape: f32[2,1,96], index: 6, kind: input, shape index: {}]   ;;  %s4735_s7 = inlined_call_operand.vmem [shape: bf16[2,32,32], index: 7, kind: input, shape index: {}]   ;;  %s4736_s8 = inlined_call_operand.vmem [shape: f32[2,1,32], index: 8, kind: input, shape index: {}]   ;;  %s4737_s9 = inlined_call_operand.vmem [shape: f32[2,1,32], index: 9, kind: input, shape index: {}]   ;;  %s4738_s10 = inlined_call_operand.vmem [shape: f32[2,1,32], index: 10, kind: input, shape index: {}]   ;;  %s4739_s11 = inlined_call_operand.vmem [shape: bf16[2,32,64], index: 11, kind: input, shape index: {}]   ;;  %s4740_s12 = inlined_call_operand.vmem [shape: f32[2,1,64], index: 12, kind: input, shape index: {}]   ;;  %s4741_s13 = inlined_call_operand.vmem [shape: bf16[2,64,32], index: 13, kind: input, shape index: {}]   ;;  %s4742_s14 = inlined_call_operand.vmem [shape: f32[2,1,32], index: 14, kind: input, shape index: {}]   ;;  %s4743_s15 = inlined_call_operand.hbm [shape: f32[16,32], index: 15, kind: output, shape index: {}]  }
   0x1   :  { %4751 = sst [smem:[#allocation15_spill]] %s4728_s0 }
   0x2   :  { %4752 = sst [smem:[#allocation16_spill]] %s4729_s1 }
   0x3   :  { %4753 = sst [smem:[#allocation17_spill]] %s4730_s2 }
   0x4   :  { %4754 = sst [smem:[#allocation18_spill]] %s4733_s5 }
   0x5   :  { %4755 = sst [smem:[#allocation19_spill]] %s4735_s7 }
   0x6   :  { %4756 = sst [smem:[#allocation20_spill]] %s4743_s15 }
   0x7   :  { %20 = vsyncpa [#allocation4], 0 }
   0x8   :  { %21 = vsyncpa [#allocation7], 0 }
   0x9   :  { %22 = vsyncpa [#allocation5], 0  ;;  %s4040_s18 = smov 0   ;;  %s4042_s19 = smov 0  }
   0xa   :  { %s4044_s20 = smov 0  }
   0xb LB: > { %4757 = sst [smem:[#allocation12_spill]] %s3936_s19  ;;  %s4744_s21 = sadd.s32 4294967295, %s3940_s20   ;;  %s3940_s20 = sphi %s4044_s20, %s28_s20   ;;  %s3936_s19 = sphi %s4042_s19, %s4781_s19   ;;  %s3932_s18 = sphi %s4040_s18, %s4780_s18  }
   0xc   : > { %4758 = sst [smem:[#allocation13_spill]] %s3940_s20  ;;  %s37_s22 = sadd.s32 1, %s3936_s19 }
   0xd   : > { %p38_p0 = scmp.ge.s32.totalorder %s37_s22, 2  ;;  %p3423_p1 = scmp.ge.s32.totalorder %s3940_s20, 1 }
   0xe   : > { %p451_p2 = scmp.lt.s32.totalorder %s3940_s20, 3  ;;  %p4067_p4 = scmp.eq.s32.totalorder %s4744_s21, 0 }
   0xf   : > { %s4783_s22 = smov (%p38_p0, %s37_s22), 0  ;;  %s3942_s25 = smov [#allocation3]  }
  0x10   : > { %4759 = sst [smem:[#allocation14_spill]] %s4783_s22  ;;  %p4061_p3 = pnand %p3423_p1, %p451_p2 }
  0x11   : > { %s4761_s24 = scalar_select %p4067_p4, 1, 0 }
  0x12   : > { %s4760_s23 = scalar_select %p4061_p3, 1, 0 }
  0x13   : > { %p3694_p5 = pneg %p4061_p3  ;;  %s466_s26 = sshll.u32 %s3942_s25, 4  ;;  %s467_s26 = int_to_ptr.vmem [resolvable:$true] %s466_s26 }
  0x14   : > { %s3943_s28 = smov [#allocation6]   ;;  %s4763_s0 = sld [smem:[#allocation15_spill]] }
  0x15   : > { %p4075_p6 = pnand %p4067_p4, %p3694_p5  ;;  %s483_s29 = sshll.u32 %s3943_s28, 4  ;;  %s4079_s29 = int_to_ptr.vmem [resolvable:$true] %s483_s29 }
  0x17   : > { %p3826_p8 = pneg %p4075_p6 }
  0x1a   : > { %s3824_s17 = scalar_lea.hbm %s4763_s0, 256 }
  0x1b   : > { %p3825_p7 = scmp.ne.s32.totalorder %s4763_s0, %s3824_s17  ;;  %p3831_p11 = scmp.lt.u32.totalorder %s3824_s17, %s4763_s0 }
  0x1d   : > { %p3827_p9 = pnand %p3826_p8, %p3825_p7 }
  0x1f   : > { %p3828_p10 = pneg %p3827_p9 }
  0x21   : > { %p3833_p12 = pnand %p3831_p11, %p3828_p10 }
  0x23   : > { %3836 = shalt.err (!%p3833_p12)
}
  0x24   : > { %s3837_s28 = scalar_lea.vmem %s467_s26, 256  ;;  %p3845_p2 = scmp.lt.s32.totalorder %s467_s26, %s467_s26 }
  0x25   : > { %p3838_p13 = scmp.ne.s32.totalorder %s467_s26, %s3837_s28  ;;  %p3846_p5 = scmp.lt.s32.totalorder %s3837_s28, %s3837_s28 }
  0x27   : > { %p3840_p0 = pnand %p3838_p13, %p3826_p8  ;;  %p3847_p4 = por %p3846_p5, %p3845_p2 }
  0x29   : > { %p3841_p1 = pneg %p3840_p0 }
  0x2b   : > { %p3848_p3 = pnand %p3847_p4, %p3841_p1 }
  0x2d   : > { %3851 = shalt.err (!%p3848_p3)
}
  0x2e   : > { %s3944_s21 = smov 128   ;;  %s3945_s22 = smov 8  }
  0x2f   : > { %3697 = dma.hbm_to_vmem [thread:$0]  (!%p4075_p6), %s4763_s0, 256, %s467_s26, [#allocation4], %s3944_s21, %s3944_s21, %s3945_s22  }
  0x30   : > { %s4764_s2 = sld [smem:[#allocation17_spill]] }
  0x36   : > { %s3852_s25 = scalar_lea.hbm %s4764_s2, 16 }
  0x37   : > { %p3853_p7 = scmp.ne.s32.totalorder %s4764_s2, %s3852_s25  ;;  %p3859_p9 = scmp.lt.u32.totalorder %s3852_s25, %s4764_s2 }
  0x39   : > { %p3855_p3 = pnand %p3853_p7, %p3826_p8 }
  0x3b   : > { %p3856_p4 = pneg %p3855_p3 }
  0x3d   : > { %p3861_p10 = pnand %p3859_p9, %p3856_p4 }
  0x3f   : > { %3864 = shalt.err (!%p3861_p10)
}
  0x40   : > { %s3865_s26 = scalar_lea.vmem %s4079_s29, 16  ;;  %s3872_s15 = scalar_lea.vmem %s4079_s29, 32 }
  0x41   : > { %p3866_p11 = scmp.ne.s32.totalorder %s4079_s29, %s3865_s26  ;;  %p3873_p0 = scmp.lt.s32.totalorder %s4079_s29, %s4079_s29 }
  0x42   : > { %p3874_p1 = scmp.lt.s32.totalorder %s3872_s15, %s3865_s26 }
  0x43   : > { %p3868_p12 = pnand %p3866_p11, %p3826_p8 }
  0x44   : > { %p3875_p2 = por %p3874_p1, %p3873_p0 }
  0x45   : > { %p3869_p13 = pneg %p3868_p12 }
  0x47   : > { %p3876_p5 = pnand %p3875_p2, %p3869_p13 }
  0x49   : > { %3879 = shalt.err (!%p3876_p5)
}
  0x4a   : > { %3700 = dma.hbm_to_vmem [thread:$0]  (!%p4075_p6), %s4764_s2, 16, %s4079_s29, [#allocation7]  }
  0x4b   : > { %p4765_p7 = scmp.ne.s32.totalorder %s4760_s23, 0 }
  0x4c   : > { %p4766_p8 = scmp.ne.s32.totalorder (!%p4765_p7), %s4761_s24, 0 }
  0x4d   : > { %576 = sbr.rel (%p4765_p7) target bundleno = 3198 (0xc7e), region = 80 }
  0x54   : > { %3919 = dma.done.wait (%p4766_p8), [#allocation4], 256  }
  0x55   : > { %3921 = vsyncadd (%p4766_p8), [#allocation4], 4294967040 }
  0x56   : > { %3923 = dma.done.wait (%p4766_p8), [#allocation7], 16  }
  0x57   : > { %3925 = vsyncadd (%p4766_p8), [#allocation7], 4294967280  ;;  %p663_p3 = scmp.lt.s32.totalorder %s3932_s18, 1  ;;  %s4767_s5 = sld [smem:[#allocation18_spill]] }
  0x58   : > { %s4768_s7 = sld [smem:[#allocation19_spill]]  ;;  %p3438_p6 = scmp.ne.s32.totalorder %s3932_s18, 0 }
  0x59   : > { %s4141_s27 = scalar_select %p663_p3, %s3932_s18, 1 }
  0x5a   : > { %712 = sbr.rel (%p3438_p6) target bundleno = 409 (0x199), region = 92  ;;  %v713_v0 = vld [vmem:[#allocation3] sm:$0xff] (!%p3438_p6)  ;;  %vm717_vm0 = vcmask (!%p3438_p6), 261120   ;;  %v714_v1 = vld [vmem:[#allocation3 + $0x8] sm:$0xff] (!%p3438_p6)  ;;  %s4769_s17 = sld [smem:[#allocation16_spill]] (!%p3438_p6) }
  0x5b   : > { %s3500_s30 = sshll.u32 %s4141_s27, 4  ;;  %s687_s0 = scalar_lea.vmem %s4737_s9, %s4141_s27  ;;  %v718_v2 = vsel (!%p3438_p6), %vm717_vm0, %v713_v0, 0.0  ;;  %v721_v3 = vsel (!%p3438_p6), %vm717_vm0, %v714_v1, 0.0  ;;  %v3440_v23 = vld [vmem:[#allocation6] ss:$0 sm:$0xff] (!%p3438_p6) }
  0x5c   : > { %s690_s25 = scalar_lea.vmem %s4738_s10, %s4141_s27  ;;  %s4181_s2 = scalar_lea.vmem %s4739_s11, %s3500_s30  ;;  %719 = vadd.xlane.f32.xlu0 (!%p3438_p6), %v718_v2 }
  0x5d   : > { %s4159_s15 = scalar_lea.vmem %s4767_s5, %s3500_s30  ;;  %s698_s5 = scalar_lea.vmem %s4740_s12, %s4141_s27 }
  0x5e   : > { %s4164_s23 = scalar_lea.vmem %s4768_s7, %s3500_s30  ;;  %s3503_s7 = sshll.u32 %s4141_s27, 5 }
  0x5f   : > { %s4191_s21 = scalar_lea.vmem %s4741_s13, %s3503_s7  ;;  %s706_s16 = scalar_lea.vmem %s4742_s14, %s4141_s27 }
  0x60   : > { %722 = vadd.xlane.f32.xlu0 (!%p3438_p6), %v721_v3  ;;  %v3439_v21 = vld [vmem:[%s4769_s17] ss:$0 sm:$0xff] (!%p3438_p6) }
  0xe9   : > { %v720_v4 = vpop.xlane.xlu0 %719 }
  0xea   : > { %v725_v5 = vmul.f32 0.03125, %v720_v4 }
  0xec   : > { %v727_v6 = vsub.f32 %v713_v0, %v725_v5 }
  0xed   : > { %v723_v7 = vpop.xlane.xlu0 %722 }
  0xee   : > { %v726_v8 = vmul.f32 0.03125, %v723_v7  ;;  %v729_v9 = vmul.f32 %v727_v6, %v727_v6 }
  0xf0   : > { %v728_v10 = vsub.f32 %v714_v1, %v726_v8  ;;  %v731_v11 = vsel %vm717_vm0, %v729_v9, 0.0 }
  0xf1   : > { %732 = vadd.xlane.f32.xlu1 %v731_v11 }
  0xf2   : > { %v730_v12 = vmul.f32 %v728_v10, %v728_v10 }
  0xf4   : > { %v734_v13 = vsel %vm717_vm0, %v730_v12, 0.0 }
  0xf5   : > { %735 = vadd.xlane.f32.xlu1 %v734_v13 }
 0x17e   : > { %v733_v14 = vpop.xlane.xlu1 %732 }
 0x17f   : > { %v737_v15 = vmul.f32 0.03125, %v733_v14 }
 0x181   : > { %v739_v16 = vadd.f32 1e-12, %v737_v15 }
 0x182   : > { %v736_v17 = vpop.xlane.xlu1 %735 }
 0x183   : > { %3749 = vrsqrt.f32 %v739_v16  ;;  %v738_v18 = vmul.f32 0.03125, %v736_v17 }
 0x185   : > { %v740_v19 = vadd.f32 1e-12, %v738_v18 }
 0x187   : > { %3751 = vrsqrt.f32 %v740_v19 }
 0x18d   : > { %v3750_v20 = vpop.eup %3749 }
 0x18e   : > { %v743_v22 = vmul.f32 %v3750_v20, %v727_v6 }
 0x190   : > { %v751_v24 = vmul.f32 %v3439_v21, %v743_v22 }
 0x191   : > { %v3752_v25 = vpop.eup %3751 }
 0x192   : > { %v759_v26 = vadd.f32 %v3440_v23, %v751_v24  ;;  %v744_v27 = vmul.f32 %v3752_v25, %v728_v10 }
 0x194   : > { %761 = vst.msk [vmem:[#allocation2] sm:$0xff] %vm717_vm0, %v759_v26  ;;  %v752_v28 = vmul.f32 %v3439_v21, %v744_v27 }
 0x196   : > { %v760_v29 = vadd.f32 %v3440_v23, %v752_v28 }
 0x198   : > { %762 = vst.msk [vmem:[#allocation2 + $0x8] sm:$0xff] %vm717_vm0, %v760_v29 }
 0x199 PF: > { %vm767_vm1 = vcmask 261120   ;;  %v3768_v44 = vld [vmem:[%s4159_s15] sm:$0xff]   ;;  %v3946_v45 = vmov 0.0   ;;  %v3769_v46 = vld [vmem:[%s4159_s15 + $0x8] sm:$0xff]   ;;  %vm3947_vm2 = vmmov 0   ;;  %s4770_s26 = scalar_lea.vmem %s4731_s3, %s4141_s27  ;;  %s4771_s24 = scalar_lea.vmem %s4732_s4, %s4141_s27  ;;  %v906_v17 = vlaneseq }
 0x19a   : > { %3550 = vmatprep.subr.bf16.mxu0 %v3946_v45  ;;  %3558 = vmatprep.subr.bf16.mxu1 %v3946_v45  ;;  %v3441_v55 = vld [vmem:[%s4770_s26] ss:$0 sm:$0xff]  ;;  %s4772_s22 = scalar_lea.vmem %s4734_s6, %s4141_s27  ;;  %s3948_s7 = smov 112   ;;  %v3952_v15 = vmov 1983009808   ;;  %vm1803_vm3 = vcmask 64512  }
 0x19b   : > { %v763_v30 = vld [vmem:[#allocation2] sm:$0xff]  ;;  %3551 = vmatpush3.bf16.msra.mxu0 %v3768_v44  ;;  %3554 = vmatprep.mubr.msk.bf16.mxu0 %vm3947_vm2, %v3946_v45  ;;  %s3949_s30 = smov 120   ;;  %s3950_s17 = smov 104   ;;  %v904_v16 = vunpack.c.l.s4 %v3952_v15  ;;  %v3953_v19 = vmov 1934713408   ;;  %v907_v22 = vshrl.u32 %v906_v17, 7 }
 0x19c   : > { %v768_v32 = vsel %vm767_vm1, %v763_v30, 0.0  ;;  %3552 = vmatprep.subr.bf16.mxu0 %v3946_v45  ;;  %3560 = vmatprep.mubr.msk.bf16.mxu1 %vm3947_vm2, %v3946_v45  ;;  %v3442_v59 = vld [vmem:[%s4771_s24] ss:$0 sm:$0xff]  ;;  %s3951_s15 = smov 96   ;;  %v936_v20 = vunpack.c.l.s4 %v3953_v19  ;;  %s3954_s28 = smov 64   ;;  %vm2271_vm4 = vcmask 1043456  }
 0x19d   : > { %769 = vadd.xlane.f32.xlu0 %v768_v32  ;;  %v3443_v0 = vld [vmem:[%s4772_s22] ss:$0 sm:$0xff]  ;;  %v905_v21 = vunpack.c.0.s8 %v904_v16  ;;  %s3955_s26 = smov 16   ;;  %s3956_s1 = smov 8   ;;  %vm2935_vm5 = vcmask 130048   ;;  %vm2938_vm6 = vcmask 195584  }
 0x19e   : > { %v937_v25 = vunpack.c.0.s8 %v936_v20  ;;  %s3957_s20 = smov 24   ;;  %s4773_s29 = scalar_lea.vmem %s4736_s8, %s4141_s27  ;;  %vm3173_vm7 = vcmask 523264  }
 0x19f   : > { %v764_v31 = vld [vmem:[#allocation2 + $0x8] sm:$0xff]  ;;  %3553 = vmatpush3.bf16.msra.mxu0 %v3769_v46  ;;  %v4284_v26 = vsub.s32 %v905_v21, %v907_v22  ;;  %p3495_p4 = scmp.ne.s32.totalorder %s3932_s18, 1 }
 0x1a0   : > { %v771_v33 = vsel %vm767_vm1, %v764_v31, 0.0  ;;  %3564 = vmatprep.subr.bf16.mxu0 %v3946_v45 }
 0x1a1   : > { %772 = vadd.xlane.f32.xlu0 %v771_v33  ;;  %v4286_v33 = vsub.s32 %v937_v25, %v907_v22 }
 0x22a   : > { %v770_v34 = vpop.xlane.xlu0 %769 }
 0x22b   : > { %v775_v35 = vmul.f32 0.03125, %v770_v34 }
 0x22d   : > { %v777_v36 = vsub.f32 %v763_v30, %v775_v35 }
 0x22e   : > { %v773_v37 = vpop.xlane.xlu0 %772 }
 0x22f   : > { %v776_v38 = vmul.f32 0.03125, %v773_v37  ;;  %v779_v39 = vmul.f32 %v777_v36, %v777_v36 }
 0x231   : > { %v778_v40 = vsub.f32 %v764_v31, %v776_v38  ;;  %v781_v41 = vsel %vm767_vm1, %v779_v39, 0.0 }
 0x232   : > { %782 = vadd.xlane.f32.xlu1 %v781_v41 }
 0x233   : > { %v780_v42 = vmul.f32 %v778_v40, %v778_v40 }
 0x235   : > { %v784_v43 = vsel %vm767_vm1, %v780_v42, 0.0 }
 0x236   : > { %785 = vadd.xlane.f32.xlu1 %v784_v43 }
 0x2bf   : > { %v783_v47 = vpop.xlane.xlu1 %782 }
 0x2c0   : > { %v787_v48 = vmul.f32 0.03125, %v783_v47 }
 0x2c2   : > { %v789_v49 = vadd.f32 1e-05, %v787_v48 }
 0x2c3   : > { %v786_v50 = vpop.xlane.xlu1 %785 }
 0x2c4   : > { %3778 = vrsqrt.f32 %v789_v49  ;;  %v788_v51 = vmul.f32 0.03125, %v786_v50 }
 0x2c6   : > { %v790_v52 = vadd.f32 1e-05, %v788_v51 }
 0x2c8   : > { %3780 = vrsqrt.f32 %v790_v52 }
 0x2ce   : > { %v3779_v53 = vpop.eup %3778 }
 0x2cf   : > { %v793_v54 = vmul.f32 %v3779_v53, %v777_v36 }
 0x2d1   : > { %v801_v58 = vmul.f32 %v3441_v55, %v793_v54 }
 0x2d2   : > { %v3781_v56 = vpop.eup %3780 }
 0x2d3   : > { %v794_v57 = vmul.f32 %v3781_v56, %v778_v40  ;;  %v809_v61 = vadd.f32 %v3442_v59, %v801_v58 }
 0x2d5   : > { %v802_v60 = vmul.f32 %v3441_v55, %v794_v57 }
 0x2d7   : > { %v810_v62 = vadd.f32 %v3442_v59, %v802_v60 }
 0x2d9   : > { %v811_v63 = vpack.c.bf16 %v810_v62, %v809_v61 }
 0x2db   : > { %3555 = vmatmul.mubr.msk.bf16.vlgmr.msra.gmra.mrb[0].mxu0 %vm767_vm1, %v811_v63 }
 0x2dc   : > { %3566 = vmatprep.mubr.msk.bf16.mxu0 %vm3947_vm2, %v3946_v45 }
 0x3ae   : > { %v872_v1 = vpop.f32.mrb[0].mxu0 }
 0x3af   : > { %v4239_v2 = vadd.f32 %v3443_v0, %v872_v1  ;;  %v3556_v3 = vpop.f32.mrb[1].mxu0 }
 0x3b0   : > { %v875_v4 = vpop.f32.mrb[2].mxu0 }
 0x3b1   : > { %1187 = vrot.lane.b32.xlu1 %v4239_v2, %s3948_s7  ;;  %1183 = vrot.lane.b32.xlu0 %v4239_v2, %s3949_s30  ;;  %v3557_v5 = vpop.f32.mrb[3].mxu0  ;;  %v4245_v6 = vadd.f32 %v3443_v0, %v875_v4  ;;  %v879_v9 = vmul.f32 0.35355338, %v4239_v2 }
 0x3b3   : > { %v4277_v14 = vmul.f32 0.35355338, %v4245_v6 }
 0x3b5   : > { %1191 = vrot.lane.b32.xlu1 %v4239_v2, %s3950_s17  ;;  %1189 = vrot.lane.b32.xlu0 %v4245_v6, %s3948_s7 }
 0x3b9   : > { %1195 = vrot.lane.b32.xlu0 %v4239_v2, %s3951_s15  ;;  %1185 = vrot.lane.b32.xlu1 %v4245_v6, %s3949_s30 }
 0x3bd   : > { %1193 = vrot.lane.b32.xlu1 %v4245_v6, %s3950_s17 }
 0x423   : > { %v4254_v7 = vpop.permute.xlu1 %1187  ;;  %v4256_v8 = vpop.permute.xlu0 %1183 }
 0x424   : > { %1203 = vrot.lane.b32.xlu0 %v4254_v7, %s3951_s15  ;;  %1199 = vrot.lane.b32.xlu1 %v4256_v8, %s3951_s15 }
 0x427   : > { %v4261_v10 = vpop.permute.xlu1 %1191  ;;  %v4270_v12 = vpop.permute.xlu0 %1189 }
 0x428   : > { %883 = vrot.lane.b32.xlu0 %v879_v9, %s3949_s30  ;;  %1207 = vrot.lane.b32.xlu1 %v4261_v10, %s3951_s15 }
 0x42b   : > { %v4266_v11 = vpop.permute.xlu1 %1185  ;;  %v1196_v18 = vpop.permute.xlu0 %1195 }
 0x42c   : > { %895 = vrot.lane.b32.xlu0 %v879_v9, %s3950_s17  ;;  %889 = vrot.lane.b32.xlu1 %v879_v9, %s3948_s7 }
 0x42f   : > { %v4272_v13 = vpop.permute.xlu1 %1193 }
 0x430   : > { %1197 = vrot.lane.b32.xlu1 %v4245_v6, %s3951_s15  ;;  %1201 = vrot.lane.b32.xlu0 %v4266_v11, %s3951_s15 }
 0x434   : > { %1205 = vrot.lane.b32.xlu1 %v4270_v12, %s3951_s15  ;;  %1209 = vrot.lane.b32.xlu0 %v4272_v13, %s3951_s15 }
 0x438   : > { %891 = vrot.lane.b32.xlu0 %v4277_v14, %s3948_s7  ;;  %885 = vrot.lane.b32.xlu1 %v4277_v14, %s3949_s30 }
 0x43c   : > { %897 = vrot.lane.b32.xlu1 %v4277_v14, %s3950_s17 }
 0x496   : > { %v1204_v23 = vpop.permute.xlu0 %1203  ;;  %v1200_v24 = vpop.permute.xlu1 %1199 }
 0x497   : > { %v1219_v27 = vcombine.low %v1196_v18, %v1204_v23  ;;  %v1220_v28 = vcombine.high %v1196_v18, %v1204_v23 }
 0x499   : > { %v1227_v34 = vrot.slane %v1219_v27, %v4284_v26  ;;  %v1234_v35 = vrot.slane %v1220_v28, %v4284_v26 }
 0x49a   : > { %v884_v29 = vpop.permute.xlu0 %883  ;;  %v1208_v30 = vpop.permute.xlu1 %1207 }
 0x49b   : > { %v1235_v31 = vcombine.low %v1200_v24, %v1208_v30  ;;  %v1236_v32 = vcombine.high %v1200_v24, %v1208_v30 }
 0x49d   : > { %v1243_v36 = vrot.slane %v1235_v31, %v4284_v26  ;;  %v1250_v37 = vrot.slane %v1236_v32, %v4284_v26 }
 0x49e   : > { %v896_v38 = vpop.permute.xlu0 %895  ;;  %v890_v39 = vpop.permute.xlu1 %889 }
 0x49f   : > { %v1251_v40 = vcombine.low %v1227_v34, %v1243_v36  ;;  %v1252_v41 = vcombine.high %v1227_v34, %v1243_v36  ;;  %v1267_v42 = vcombine.low %v1234_v35, %v1250_v37  ;;  %v1268_v43 = vcombine.high %v1234_v35, %v1250_v37 }
 0x4a0   : > { %v917_v44 = vcombine.low %v884_v29, %v896_v38  ;;  %v918_v46 = vcombine.high %v884_v29, %v896_v38  ;;  %v901_v47 = vcombine.low %v879_v9, %v890_v39  ;;  %v902_v48 = vcombine.high %v879_v9, %v890_v39 }
 0x4a1   : > { %v1259_v49 = vrot.slane %v1251_v40, %v4286_v33  ;;  %v1266_v50 = vrot.slane %v1252_v41, %v4286_v33  ;;  %v1275_v51 = vrot.slane %v1267_v42, %v4286_v33  ;;  %v1282_v52 = vrot.slane %v1268_v43, %v4286_v33 }
 0x4a2   : > { %v925_v53 = vrot.slane %v917_v44, %v4284_v26  ;;  %v932_v54 = vrot.slane %v918_v46, %v4284_v26  ;;  %v909_v55 = vrot.slane %v901_v47, %v4284_v26  ;;  %v916_v56 = vrot.slane %v902_v48, %v4284_v26  ;;  %v1202_v57 = vpop.permute.xlu0 %1201  ;;  %v1198_v58 = vpop.permute.xlu1 %1197 }
 0x4a3   : > { %v1355_v59 = vcombine.low %v1259_v49, %v1266_v50  ;;  %v3451_v60 = vcombine.high %v1259_v49, %v1266_v50  ;;  %v1371_v61 = vcombine.low %v1275_v51, %v1282_v52  ;;  %v3452_v62 = vcombine.high %v1275_v51, %v1282_v52 }
 0x4a4   : > { %v933_v63 = vcombine.low %v909_v55, %v925_v53  ;;  %v934_v0 = vcombine.high %v909_v55, %v925_v53  ;;  %v949_v1 = vcombine.low %v916_v56, %v932_v54  ;;  %v950_v3 = vcombine.high %v916_v56, %v932_v54 }
 0x4a5   : > { %v4305_v22 = vrot.slane %v1355_v59, %v4284_v26  ;;  %v4308_v23 = vrot.slane %v3451_v60, %v4284_v26  ;;  %v4311_v24 = vrot.slane %v1371_v61, %v4284_v26  ;;  %v4314_v25 = vrot.slane %v3452_v62, %v4284_v26 }
 0x4a6   : > { %v941_v4 = vrot.slane %v933_v63, %v4286_v33  ;;  %v948_v5 = vrot.slane %v934_v0, %v4286_v33  ;;  %v957_v9 = vrot.slane %v949_v1, %v4286_v33  ;;  %v964_v15 = vrot.slane %v950_v3, %v4286_v33  ;;  %v1210_v16 = vpop.permute.xlu0 %1209  ;;  %v1206_v17 = vpop.permute.xlu1 %1205 }
 0x4a7   : > { %v1303_v18 = vcombine.low %v1202_v57, %v1210_v16  ;;  %v1304_v19 = vcombine.high %v1202_v57, %v1210_v16  ;;  %v1287_v20 = vcombine.low %v1198_v58, %v1206_v17  ;;  %v1288_v21 = vcombine.high %v1198_v58, %v1206_v17 }
 0x4a8   : > { %v1037_v31 = vcombine.low %v941_v4, %v948_v5  ;;  %v3447_v32 = vcombine.high %v941_v4, %v948_v5  ;;  %v1053_v34 = vcombine.low %v957_v9, %v964_v15  ;;  %v3448_v35 = vcombine.high %v957_v9, %v964_v15 }
 0x4a9   : > { %v1311_v27 = vrot.slane %v1303_v18, %v4284_v26  ;;  %v1318_v28 = vrot.slane %v1304_v19, %v4284_v26  ;;  %v1295_v29 = vrot.slane %v1287_v20, %v4284_v26  ;;  %v1302_v30 = vrot.slane %v1288_v21, %v4284_v26 }
 0x4aa   : > { %v892_v36 = vpop.permute.xlu0 %891  ;;  %v886_v37 = vpop.permute.xlu1 %885  ;;  %v4327_v49 = vrot.slane %v1037_v31, %v4284_v26  ;;  %v4330_v50 = vrot.slane %v3447_v32, %v4284_v26  ;;  %v1387_v52 = vcombine.low %v4305_v22, %v4308_v23  ;;  %v4337_v53 = vrot.slane %v1053_v34, %v4284_v26 }
 0x4ab   : > { %v1319_v38 = vcombine.low %v1295_v29, %v1311_v27  ;;  %v1320_v39 = vcombine.high %v1295_v29, %v1311_v27  ;;  %v1335_v40 = vcombine.low %v1302_v30, %v1318_v28  ;;  %v1336_v41 = vcombine.high %v1302_v30, %v1318_v28 }
 0x4ac   : > { %v969_v42 = vcombine.low %v4277_v14, %v892_v36  ;;  %v970_v43 = vcombine.high %v4277_v14, %v892_v36  ;;  %v1403_v14 = vcombine.low %v4311_v24, %v4314_v25  ;;  %v4340_v54 = vrot.slane %v3448_v35, %v4284_v26 }
 0x4ad   : > { %v1327_v44 = vrot.slane %v1319_v38, %v4286_v33  ;;  %v1334_v46 = vrot.slane %v1320_v39, %v4286_v33  ;;  %v1343_v47 = vrot.slane %v1335_v40, %v4286_v33  ;;  %v1350_v48 = vrot.slane %v1336_v41, %v4286_v33 }
 0x4ae   : > { %v898_v51 = vpop.permute.xlu1 %897  ;;  %v977_v56 = vrot.slane %v969_v42, %v4284_v26  ;;  %v1395_v59 = vrot.slane %v1387_v52, %v4286_v33  ;;  %v1411_v60 = vrot.slane %v1403_v14, %v4286_v33  ;;  %v984_v0 = vrot.slane %v970_v43, %v4284_v26 }
 0x4af   : > { %v1423_v55 = vcombine.low %v1327_v44, %v1334_v46  ;;  %v985_v57 = vcombine.low %v886_v37, %v898_v51  ;;  %v986_v58 = vcombine.high %v886_v37, %v898_v51  ;;  %v3453_v61 = vcombine.high %v1327_v44, %v1334_v46 }
 0x4b0   : > { %v1439_v62 = vcombine.low %v1343_v47, %v1350_v48  ;;  %v3454_v63 = vcombine.high %v1343_v47, %v1350_v48  ;;  %v1419_v4 = vcombine.low %v1395_v59, %v1411_v60  ;;  %v1420_v5 = vcombine.high %v1395_v59, %v1411_v60 }
 0x4b1   : > { %v993_v1 = vrot.slane %v985_v57, %v4284_v26  ;;  %v1000_v3 = vrot.slane %v986_v58, %v4284_v26  ;;  %v4349_v9 = vrot.slane %v1423_v55, %v4284_v26  ;;  %v1069_v15 = vcombine.low %v4327_v49, %v4330_v50 }
 0x4b2   : > { %v1085_v16 = vcombine.low %v4337_v53, %v4340_v54  ;;  %v1388_v17 = vcombine.high %v4305_v22, %v4308_v23  ;;  %v1491_v27 = vpack.c.bf16 %v1419_v4, %v1419_v4  ;;  %v1492_v28 = vpack.c.bf16 %v1420_v5, %v1420_v5 }
 0x4b3   : > { %v1001_v18 = vcombine.low %v977_v56, %v993_v1  ;;  %v1002_v19 = vcombine.high %v977_v56, %v993_v1  ;;  %v1017_v20 = vcombine.low %v984_v0, %v1000_v3  ;;  %v1018_v21 = vcombine.high %v984_v0, %v1000_v3 }
 0x4b4   : > { %v1077_v29 = vrot.slane %v1069_v15, %v4286_v33  ;;  %v1093_v30 = vrot.slane %v1085_v16, %v4286_v33  ;;  %v1438_v22 = vrot.slane %v3453_v61, %v4284_v26  ;;  %v1808_v23 = vsel %vm1803_vm3, %v1491_v27, 0 }
 0x4b5   : > { %v1009_v31 = vrot.slane %v1001_v18, %v4286_v33  ;;  %v1016_v32 = vrot.slane %v1002_v19, %v4286_v33  ;;  %v1025_v34 = vrot.slane %v1017_v20, %v4286_v33  ;;  %v1032_v35 = vrot.slane %v1018_v21, %v4286_v33  ;;  %3559 = vmatpush3.bf16.xpose.msra.mxu1 %v1808_v23 }
 0x4b6   : > { %v1854_v36 = vsel %vm1803_vm3, %v1492_v28, 0  ;;  %v1404_v37 = vcombine.high %v4311_v24, %v4314_v25  ;;  %v1101_v38 = vcombine.low %v1077_v29, %v1093_v30  ;;  %v1102_v39 = vcombine.high %v1077_v29, %v1093_v30  ;;  %3570 = vmatprep.subr.bf16.mxu1 %v3946_v45 }
 0x4b7   : > { %v1105_v40 = vcombine.low %v1009_v31, %v1016_v32  ;;  %v3449_v41 = vcombine.high %v1009_v31, %v1016_v32  ;;  %3565 = vmatpush3.bf16.xpose.msra.mxu0 %v1854_v36  ;;  %v1402_v42 = vrot.slane %v1388_v17, %v4286_v33  ;;  %v1446_v43 = vrot.slane %v1439_v62, %v4284_v26 }
 0x4b8   : > { %v1454_v44 = vrot.slane %v3454_v63, %v4284_v26  ;;  %v1121_v46 = vcombine.low %v1025_v34, %v1032_v35  ;;  %v3450_v47 = vcombine.high %v1025_v34, %v1032_v35  ;;  %3576 = vmatprep.subr.bf16.mxu0 %v3946_v45  ;;  %v1070_v24 = vcombine.high %v4327_v49, %v4330_v50 }
 0x4b9   : > { %v1086_v25 = vcombine.high %v4337_v53, %v4340_v54  ;;  %v1418_v48 = vrot.slane %v1404_v37, %v4286_v33  ;;  %v1455_v51 = vcombine.low %v4349_v9, %v1438_v22  ;;  %v1173_v52 = vpack.c.bf16 %v1101_v38, %v1101_v38 }
 0x4ba   : > { %v1174_v14 = vpack.c.bf16 %v1102_v39, %v1102_v39  ;;  %v1112_v55 = vrot.slane %v1105_v40, %v4284_v26  ;;  %v1120_v56 = vrot.slane %v3449_v41, %v4284_v26  ;;  %v1128_v59 = vrot.slane %v1121_v46, %v4284_v26 }
 0x4bb   : > { %v1421_v57 = vcombine.low %v1402_v42, %v1418_v48  ;;  %v1422_v58 = vcombine.high %v1402_v42, %v1418_v48  ;;  %v1136_v60 = vrot.slane %v3450_v47, %v4284_v26  ;;  %v1463_v49 = vrot.slane %v1455_v51, %v4286_v33 }
 0x4bc   : > { %v1471_v50 = vcombine.low %v1446_v43, %v1454_v44  ;;  %3561 = vmatmul.mubr.msk.bf16.vlgmr.msra.gmra.mrb[0].mxu1 %vm1803_vm3, %v1173_v52  ;;  %v1084_v61 = vrot.slane %v1070_v24, %v4286_v33  ;;  %v1100_v62 = vrot.slane %v1086_v25, %v4286_v33  ;;  %v1456_v3 = vcombine.high %v4349_v9, %v1438_v22 }
 0x4bd   : > { %v1493_v53 = vpack.c.bf16 %v1421_v57, %v1421_v57  ;;  %v1494_v54 = vpack.c.bf16 %v1422_v58, %v1422_v58  ;;  %3572 = vmatprep.mubr.msk.bf16.mxu1 %vm3947_vm2, %v3946_v45  ;;  %v1472_v4 = vcombine.high %v1446_v43, %v1454_v44  ;;  %v1137_v5 = vcombine.low %v1112_v55, %v1120_v56 }
 0x4be   : > { %3567 = vmatmul.mubr.msk.bf16.vlgmr.msra.gmra.mrb[4].mxu0 %vm1803_vm3, %v1174_v14  ;;  %v1479_v63 = vrot.slane %v1471_v50, %v4286_v33  ;;  %v1153_v17 = vcombine.low %v1128_v59, %v1136_v60  ;;  %v1103_v18 = vcombine.low %v1084_v61, %v1100_v62  ;;  %v1104_v19 = vcombine.high %v1084_v61, %v1100_v62 }
 0x4bf   : > { %v1900_v0 = vsel %vm1803_vm3, %v1493_v53, 0  ;;  %v1946_v1 = vsel %vm1803_vm3, %v1494_v54, 0  ;;  %3578 = vmatprep.mubr.msk.bf16.mxu0 %vm3947_vm2, %v3946_v45  ;;  %v1470_v27 = vrot.slane %v1456_v3, %v4286_v33  ;;  %v1486_v28 = vrot.slane %v1472_v4, %v4286_v33 }
 0x4c0   : > { %3571 = vmatpush3.bf16.xpose.msra.mxu1 %v1900_v0  ;;  %3577 = vmatpush3.bf16.xpose.msra.mxu0 %v1946_v1  ;;  %v1487_v15 = vcombine.low %v1463_v49, %v1479_v63  ;;  %v1488_v16 = vcombine.high %v1463_v49, %v1479_v63  ;;  %v1175_v9 = vpack.c.bf16 %v1103_v18, %v1103_v18 }
 0x4c1   : > { %3582 = vmatprep.subr.bf16.mxu1 %v3946_v45  ;;  %3588 = vmatprep.subr.bf16.mxu0 %v3946_v45  ;;  %v1176_v29 = vpack.c.bf16 %v1104_v19, %v1104_v19  ;;  %v1145_v30 = vrot.slane %v1137_v5, %v4286_v33  ;;  %v1161_v31 = vrot.slane %v1153_v17, %v4286_v33 }
 0x4c2   : > { %v1495_v20 = vpack.c.bf16 %v1487_v15, %v1487_v15  ;;  %v1496_v21 = vpack.c.bf16 %v1488_v16, %v1488_v16  ;;  %v1489_v35 = vcombine.low %v1470_v27, %v1486_v28  ;;  %v1490_v22 = vcombine.high %v1470_v27, %v1486_v28 }
 0x4c3   : > { %v1138_v23 = vcombine.high %v1112_v55, %v1120_v56  ;;  %v1154_v36 = vcombine.high %v1128_v59, %v1136_v60  ;;  %v1169_v37 = vcombine.low %v1145_v30, %v1161_v31  ;;  %v1170_v38 = vcombine.high %v1145_v30, %v1161_v31 }
 0x4c4   : > { %v1992_v32 = vsel %vm1803_vm3, %v1495_v20, 0  ;;  %v2038_v34 = vsel %vm1803_vm3, %v1496_v21, 0  ;;  %v1497_v39 = vpack.c.bf16 %v1489_v35, %v1489_v35  ;;  %v1498_v40 = vpack.c.bf16 %v1490_v22, %v1490_v22 }
 0x4c5   : > { %v1177_v41 = vpack.c.bf16 %v1169_v37, %v1169_v37  ;;  %v1178_v42 = vpack.c.bf16 %v1170_v38, %v1170_v38  ;;  %v1152_v43 = vrot.slane %v1138_v23, %v4286_v33  ;;  %v1168_v44 = vrot.slane %v1154_v36, %v4286_v33 }
 0x4c6   : > { %v2084_v46 = vsel %vm1803_vm3, %v1497_v39, 0  ;;  %v2130_v47 = vsel %vm1803_vm3, %v1498_v40, 0 }
 0x4c7   : > { %3573 = vmatmul.mubr.msk.bf16.vlgmr.msra.gmra.mrb[4].mxu1 %vm1803_vm3, %v1175_v9  ;;  %3579 = vmatmul.mubr.msk.bf16.vlgmr.msra.gmra.mrb[8].mxu0 %vm1803_vm3, %v1176_v29  ;;  %v1171_v24 = vcombine.low %v1152_v43, %v1168_v44  ;;  %v1172_v25 = vcombine.high %v1152_v43, %v1168_v44 }
 0x4c8   : > { %3583 = vmatpush3.bf16.xpose.msra.mxu1 %v1992_v32  ;;  %3589 = vmatpush3.bf16.xpose.msra.mxu0 %v2038_v34 }
 0x4c9   : > { %3584 = vmatprep.mubr.msk.bf16.mxu1 %vm3947_vm2, %v3946_v45  ;;  %3590 = vmatprep.mubr.msk.bf16.mxu0 %vm3947_vm2, %v3946_v45  ;;  %v1179_v48 = vpack.c.bf16 %v1171_v24, %v1171_v24  ;;  %v1180_v51 = vpack.c.bf16 %v1172_v25, %v1172_v25 }
 0x4ca   : > { %3594 = vmatprep.subr.bf16.mxu1 %v3946_v45  ;;  %3600 = vmatprep.subr.bf16.mxu0 %v3946_v45 }
 0x4cf   : > { %3585 = vmatmul.mubr.msk.bf16.vlgmr.msra.gmra.mrb[8].mxu1 %vm1803_vm3, %v1177_v41  ;;  %3591 = vmatmul.mubr.msk.bf16.vlgmr.msra.gmra.mrb[12].mxu0 %vm1803_vm3, %v1178_v42 }
 0x4d0   : > { %3595 = vmatpush3.bf16.xpose.msra.mxu1 %v2084_v46  ;;  %3601 = vmatpush3.bf16.xpose.msra.mxu0 %v2130_v47 }
 0x4d1   : > { %3596 = vmatprep.mubr.msk.bf16.mxu1 %vm3947_vm2, %v3946_v45  ;;  %3602 = vmatprep.mubr.msk.bf16.mxu0 %vm3947_vm2, %v3946_v45 }
 0x4d2   : > { %3606 = vmatprep.subr.bf16.mxu1 %v3946_v45  ;;  %3612 = vmatprep.subr.bf16.mxu0 %v3946_v45 }
 0x4d7   : > { %3597 = vmatmul.mubr.msk.bf16.vlgmr.msra.gmra.mrb[12].mxu1 %vm1803_vm3, %v1179_v48  ;;  %3603 = vmatmul.mubr.msk.bf16.vlgmr.msra.gmra.mrb[16].mxu0 %vm1803_vm3, %v1180_v51 }
 0x4d8   : > { %3608 = vmatprep.mubr.msk.bf16.mxu1 %vm3947_vm2, %v3946_v45  ;;  %3614 = vmatprep.mubr.msk.bf16.mxu0 %vm3947_vm2, %v3946_v45 }
 0x58f   : > { %v1844_v52 = vpop.f32.mrb[0].mxu1 }
 0x590   : > { %v3562_v55 = vpop.f32.mrb[1].mxu1  ;;  %v2172_v56 = vsel %vm1803_vm3, %v1844_v52, -inf }
 0x591   : > { %v1890_v14 = vpop.f32.mrb[4].mxu0  ;;  %v1847_v58 = vpop.f32.mrb[2].mxu1  ;;  %2173 = vmax.xlane.f32.xlu0 %v2172_v56 }
 0x592   : > { %v3568_v57 = vpop.f32.mrb[5].mxu0  ;;  %v2175_v59 = vsel %vm1803_vm3, %v1890_v14, -inf  ;;  %v3563_v49 = vpop.f32.mrb[3].mxu1 }
 0x593   : > { %2176 = vmax.xlane.f32.xlu1 %v2175_v59  ;;  %v1893_v60 = vpop.f32.mrb[6].mxu0 }
 0x594   : > { %v3569_v50 = vpop.f32.mrb[7].mxu0 }
 0x59a   : > { %v1936_v53 = vpop.f32.mrb[4].mxu1  ;;  %v1982_v54 = vpop.f32.mrb[8].mxu0 }
 0x59b   : > { %v3574_v61 = vpop.f32.mrb[5].mxu1  ;;  %v3580_v62 = vpop.f32.mrb[9].mxu0  ;;  %v2178_v63 = vsel %vm1803_vm3, %v1936_v53, -inf  ;;  %v2181_v5 = vsel %vm1803_vm3, %v1982_v54, -inf }
 0x59c   : > { %v1939_v0 = vpop.f32.mrb[6].mxu1  ;;  %2179 = vmax.xlane.f32.xlu0 %v2178_v63  ;;  %v1985_v1 = vpop.f32.mrb[10].mxu0 }
 0x59d   : > { %v3575_v3 = vpop.f32.mrb[7].mxu1  ;;  %v3581_v4 = vpop.f32.mrb[11].mxu0 }
 0x5a0   : > { %2182 = vmax.xlane.f32.xlu0 %v2181_v5 }
 0x5a2   : > { %v2028_v15 = vpop.f32.mrb[8].mxu1  ;;  %v2074_v16 = vpop.f32.mrb[12].mxu0 }
 0x5a3   : > { %v3586_v17 = vpop.f32.mrb[9].mxu1  ;;  %v3592_v18 = vpop.f32.mrb[13].mxu0  ;;  %v2184_v19 = vsel %vm1803_vm3, %v2028_v15, -inf  ;;  %v2187_v20 = vsel %vm1803_vm3, %v2074_v16, -inf }
 0x5a4   : > { %v2031_v21 = vpop.f32.mrb[10].mxu1  ;;  %2185 = vmax.xlane.f32.xlu0 %v2184_v19  ;;  %2188 = vmax.xlane.f32.xlu1 %v2187_v20  ;;  %v2077_v27 = vpop.f32.mrb[14].mxu0 }
 0x5a5   : > { %v3587_v28 = vpop.f32.mrb[11].mxu1  ;;  %v3593_v9 = vpop.f32.mrb[15].mxu0 }
 0x5aa   : > { %v4436_v29 = vpop.f32.mrb[12].mxu1  ;;  %v4438_v30 = vpop.f32.mrb[16].mxu0 }
 0x5ab   : > { %v3598_v31 = vpop.f32.mrb[13].mxu1  ;;  %v3604_v32 = vpop.f32.mrb[17].mxu0  ;;  %v2190_v34 = vsel %vm1803_vm3, %v4436_v29, -inf  ;;  %v2193_v37 = vsel %vm1803_vm3, %v4438_v30, -inf }
 0x5ac   : > { %v2123_v35 = vpop.f32.mrb[14].mxu1  ;;  %2191 = vmax.xlane.f32.xlu0 %v2190_v34  ;;  %v2169_v22 = vpop.f32.mrb[18].mxu0 }
 0x5ad   : > { %v3599_v23 = vpop.f32.mrb[15].mxu1  ;;  %v3605_v36 = vpop.f32.mrb[19].mxu0 }
 0x5b5   : > { %1503 = vrot.lane.b32.xlu1 %v4256_v8, %s3954_s28 }
 0x5b9   : > { %1507 = vrot.lane.b32.xlu1 %v4254_v7, %s3954_s28 }
 0x5c2   : > { %1499 = vrot.lane.b32.xlu0 %v4239_v2, %s3954_s28 }
 0x5dd   : > { %2194 = vmax.xlane.f32.xlu1 %v2193_v37 }
 0x5ee   : > { %1511 = vrot.lane.b32.xlu1 %v4261_v10, %s3954_s28 }
 0x61e   : > { %v2174_v38 = vpop.xlane.xlu0 %2173 }
 0x61f   : > { %v2196_v39 = vsub.f32 %v1844_v52, %v2174_v38 }
 0x620   : > { %v2177_v40 = vpop.xlane.xlu1 %2176 }
 0x621   : > { %v2197_v41 = vsub.f32 %v1890_v14, %v2177_v40  ;;  %v2204_v42 = vmul.f32 1.442695, %v2196_v39 }
 0x623   : > { %v2206_v43 = vmul.f32 1.442695, %v2197_v41  ;;  %3782 = vpow2.f32 %v2204_v42 }
 0x625   : > { %3784 = vpow2.f32 %v2206_v43 }
 0x629   : > { %v2180_v8 = vpop.xlane.xlu0 %2179 }
 0x62a   : > { %v2198_v7 = vsub.f32 %v1936_v53, %v2180_v8 }
 0x62c   : > { %v2208_v44 = vmul.f32 1.442695, %v2198_v7 }
 0x62d   : > { %v2183_v46 = vpop.xlane.xlu0 %2182  ;;  %v4452_v2 = vpop.eup %3782 }
 0x62e   : > { %3786 = vpow2.f32 %v2208_v44  ;;  %v2199_v47 = vsub.f32 %v1982_v54, %v2183_v46  ;;  %v2220_v10 = vsel %vm1803_vm3, %v4452_v2, 0.0 }
 0x62f   : > { %v4454_v24 = vpop.eup %3784  ;;  %2221 = vadd.xlane.f32.xlu0 %v2220_v10 }
 0x630   : > { %v2210_v25 = vmul.f32 1.442695, %v2199_v47  ;;  %v2223_v48 = vsel %vm1803_vm3, %v4454_v24, 0.0 }
 0x631   : > { %v2186_v51 = vpop.xlane.xlu0 %2185  ;;  %v2189_v52 = vpop.xlane.xlu1 %2188  ;;  %2224 = vadd.xlane.f32.xlu1 %v2223_v48 }
 0x632   : > { %3788 = vpow2.f32 %v2210_v25  ;;  %v2200_v14 = vsub.f32 %v2028_v15, %v2186_v51  ;;  %v2201_v55 = vsub.f32 %v2074_v16, %v2189_v52 }
 0x634   : > { %v2212_v56 = vmul.f32 1.442695, %v2200_v14  ;;  %v2214_v57 = vmul.f32 1.442695, %v2201_v55 }
 0x635   : > { %v1504_v62 = vpop.permute.xlu1 %1503 }
 0x636   : > { %3790 = vpow2.f32 %v2212_v56 }
 0x637   : > { %3792 = vpow2.f32 %v2214_v57 }
 0x638   : > { %v4460_v58 = vpop.eup %3786 }
 0x639   : > { %v2226_v59 = vsel %vm1803_vm3, %v4460_v58, 0.0  ;;  %v2192_v63 = vpop.xlane.xlu0 %2191  ;;  %v1508_v1 = vpop.permute.xlu1 %1507 }
 0x63a   : > { %2227 = vadd.xlane.f32.xlu0 %v2226_v59  ;;  %v2202_v0 = vsub.f32 %v4436_v29, %v2192_v63 }
 0x63c   : > { %v4464_v60 = vpop.eup %3788  ;;  %v2216_v3 = vmul.f32 1.442695, %v2202_v0 }
 0x63d   : > { %v2229_v49 = vsel %vm1803_vm3, %v4464_v60, 0.0  ;;  %v1500_v4 = vpop.permute.xlu0 %1499 }
 0x63e   : > { %2230 = vadd.xlane.f32.xlu1 %v2229_v49  ;;  %3794 = vpow2.f32 %v2216_v3  ;;  %v1524_v16 = vcombine.high %v1500_v4, %v1508_v1 }
 0x640   : > { %v4468_v50 = vpop.eup %3790  ;;  %v1538_v19 = vrot.slane %v1524_v16, %v4284_v26 }
 0x641   : > { %v2232_v53 = vsel %vm1803_vm3, %v4468_v50, 0.0  ;;  %v4472_v54 = vpop.eup %3792 }
 0x642   : > { %2233 = vadd.xlane.f32.xlu0 %v2232_v53  ;;  %v2235_v61 = vsel %vm1803_vm3, %v4472_v54, 0.0 }
 0x646   : > { %2236 = vadd.xlane.f32.xlu0 %v2235_v61 }
 0x648   : > { %v4494_v35 = vpop.eup %3794 }
 0x649   : > { %v2238_v43 = vsel %vm1803_vm3, %v4494_v35, 0.0 }
 0x64f   : > { %1505 = vrot.lane.b32.xlu1 %v4266_v11, %s3954_s28  ;;  %v1523_v11 = vcombine.low %v1500_v4, %v1508_v1 }
 0x653   : > { %1509 = vrot.lane.b32.xlu1 %v4270_v12, %s3954_s28 }
 0x657   : > { %1513 = vrot.lane.b32.xlu1 %v4272_v13, %s3954_s28 }
 0x65c   : > { %1501 = vrot.lane.b32.xlu0 %v4245_v6, %s3954_s28  ;;  %v1531_v6 = vrot.slane %v1523_v11, %v4284_v26 }
 0x66a   : > { %v2195_v5 = vpop.xlane.xlu1 %2194 }
 0x66b   : > { %v2203_v15 = vsub.f32 %v4438_v30, %v2195_v5 }
 0x66d   : > { %v2218_v12 = vmul.f32 1.442695, %v2203_v15 }
 0x66e   : > { %v1512_v17 = vpop.permute.xlu1 %1511 }
 0x66f   : > { %3796 = vpow2.f32 %v2218_v12  ;;  %v1539_v13 = vcombine.low %v1504_v62, %v1512_v17  ;;  %v1540_v18 = vcombine.high %v1504_v62, %v1512_v17 }
 0x671   : > { %v1547_v20 = vrot.slane %v1539_v13, %v4284_v26  ;;  %v1554_v21 = vrot.slane %v1540_v18, %v4284_v26 }
 0x673   : > { %v1555_v27 = vcombine.low %v1531_v6, %v1547_v20  ;;  %v1556_v28 = vcombine.high %v1531_v6, %v1547_v20  ;;  %v1571_v9 = vcombine.low %v1538_v19, %v1554_v21  ;;  %v1572_v29 = vcombine.high %v1538_v19, %v1554_v21 }
 0x675   : > { %v1563_v30 = vrot.slane %v1555_v27, %v4286_v33  ;;  %v1570_v31 = vrot.slane %v1556_v28, %v4286_v33  ;;  %v1579_v32 = vrot.slane %v1571_v9, %v4286_v33  ;;  %v1586_v34 = vrot.slane %v1572_v29, %v4286_v33 }
 0x677   : > { %v1659_v22 = vcombine.low %v1563_v30, %v1570_v31  ;;  %v3455_v23 = vcombine.high %v1563_v30, %v1570_v31  ;;  %v1675_v36 = vcombine.low %v1579_v32, %v1586_v34  ;;  %v3456_v37 = vcombine.high %v1579_v32, %v1586_v34 }
 0x679   : > { %v4496_v38 = vpop.eup %3796  ;;  %v1666_v39 = vrot.slane %v1659_v22, %v4284_v26  ;;  %v1674_v40 = vrot.slane %v3455_v23, %v4284_v26  ;;  %v1682_v41 = vrot.slane %v1675_v36, %v4284_v26  ;;  %v1690_v42 = vrot.slane %v3456_v37, %v4284_v26 }
 0x67a   : > { %v2241_v8 = vsel %vm1803_vm3, %v4496_v38, 0.0 }
 0x67b   : > { %2239 = vadd.xlane.f32.xlu0 %v2238_v43  ;;  %2242 = vadd.xlane.f32.xlu1 %v2241_v8  ;;  %v1691_v7 = vcombine.low %v1666_v39, %v1674_v40  ;;  %v1707_v44 = vcombine.low %v1682_v41, %v1690_v42  ;;  %v1692_v46 = vcombine.high %v1666_v39, %v1674_v40 }
 0x67c   : > { %v1708_v47 = vcombine.high %v1682_v41, %v1690_v42 }
 0x67d   : > { %v1699_v10 = vrot.slane %v1691_v7, %v4286_v33  ;;  %v1715_v25 = vrot.slane %v1707_v44, %v4286_v33  ;;  %v1706_v48 = vrot.slane %v1692_v46, %v4286_v33 }
 0x67e   : > { %v1722_v51 = vrot.slane %v1708_v47, %v4286_v33 }
 0x67f   : > { %v1723_v52 = vcombine.low %v1699_v10, %v1715_v25  ;;  %v1724_v14 = vcombine.high %v1699_v10, %v1715_v25 }
 0x680   : > { %v1725_v55 = vcombine.low %v1706_v48, %v1722_v51  ;;  %v1726_v56 = vcombine.high %v1706_v48, %v1722_v51 }
 0x681   : > { %v1795_v57 = vpack.c.bf16 %v1723_v52, %v1723_v52  ;;  %v1796_v59 = vpack.c.bf16 %v1724_v14, %v1724_v14 }
 0x682   : > { %v1797_v4 = vpack.c.bf16 %v1725_v55, %v1725_v55  ;;  %v1798_v15 = vpack.c.bf16 %v1726_v56, %v1726_v56 }
 0x683   : > { %v2273_v49 = vsel %vm2271_vm4, %v1795_v57, 0  ;;  %v2319_v53 = vsel %vm2271_vm4, %v1796_v59, 0 }
 0x684   : > { %3607 = vmatpush3.bf16.msra.mxu1 %v2273_v49  ;;  %3613 = vmatpush3.bf16.msra.mxu0 %v2319_v53  ;;  %v2365_v17 = vsel %vm2271_vm4, %v1797_v4, 0  ;;  %v2411_v13 = vsel %vm2271_vm4, %v1798_v15, 0 }
 0x685   : > { %3618 = vmatprep.subr.bf16.mxu1 %v3946_v45  ;;  %3624 = vmatprep.subr.bf16.mxu0 %v3946_v45 }
 0x6bc   : > { %v2222_v61 = vpop.xlane.xlu0 %2221 }
 0x6bd   : > { %3798 = vrcp.f32 %v2222_v61 }
 0x6be   : > { %v2225_v62 = vpop.xlane.xlu1 %2224 }
 0x6bf   : > { %3800 = vrcp.f32 %v2225_v62 }
 0x6c7   : > { %v2228_v63 = vpop.xlane.xlu0 %2227  ;;  %v3799_v0 = vpop.eup %3798 }
 0x6c8   : > { %3802 = vrcp.f32 %v2228_v63  ;;  %v2252_v3 = vmul.f32 %v3799_v0, %v4452_v2 }
 0x6c9   : > { %v3801_v1 = vpop.eup %3800 }
 0x6ca   : > { %v2253_v5 = vmul.f32 %v3801_v1, %v4454_v24  ;;  %v2260_v16 = vpack.c.bf16 %v2252_v3, %v2252_v3 }
 0x6cb   : > { %v2231_v11 = vpop.xlane.xlu1 %2230 }
 0x6cc   : > { %3804 = vrcp.f32 %v2231_v11  ;;  %v2261_v12 = vpack.c.bf16 %v2253_v5, %v2253_v5  ;;  %3609 = vmatmul.mubr.msk.bf16.vlgmr.msra.gmra.mrb[16].mxu1 %vm1803_vm3, %v2260_v16 }
 0x6cd   : > { %3619 = vmatpush3.bf16.msra.mxu1 %v2365_v17  ;;  %3620 = vmatprep.mubr.msk.bf16.mxu1 %vm3947_vm2, %v3946_v45 }
 0x6ce   : > { %3615 = vmatmul.mubr.msk.bf16.vlgmr.msra.gmra.mrb[20].mxu0 %vm1803_vm3, %v2261_v12  ;;  %3630 = vmatprep.subr.bf16.mxu1 %v3946_v45 }
 0x6cf   : > { %v2234_v18 = vpop.xlane.xlu0 %2233  ;;  %3625 = vmatpush3.bf16.msra.mxu0 %v2411_v13  ;;  %v1506_v2 = vpop.permute.xlu1 %1505  ;;  %3626 = vmatprep.mubr.msk.bf16.mxu0 %vm3947_vm2, %v3946_v45 }
 0x6d0   : > { %3636 = vmatprep.subr.bf16.mxu0 %v3946_v45  ;;  %3806 = vrcp.f32 %v2234_v18 }
 0x6d2   : > { %v3803_v24 = vpop.eup %3802 }
 0x6d3   : > { %v2254_v6 = vmul.f32 %v3803_v24, %v4460_v58  ;;  %v2237_v19 = vpop.xlane.xlu0 %2236  ;;  %v1510_v20 = vpop.permute.xlu1 %1509 }
 0x6d4   : > { %3808 = vrcp.f32 %v2237_v19 }
 0x6d5   : > { %v2262_v21 = vpack.c.bf16 %v2254_v6, %v2254_v6 }
 0x6d6   : > { %v3805_v27 = vpop.eup %3804 }
 0x6d7   : > { %v2255_v28 = vmul.f32 %v3805_v27, %v4464_v60  ;;  %v1502_v9 = vpop.permute.xlu0 %1501  ;;  %3621 = vmatmul.mubr.msk.bf16.vlgmr.msra.gmra.mrb[20].mxu1 %vm1803_vm3, %v2262_v21  ;;  %v1514_v29 = vpop.permute.xlu1 %1513 }
 0x6d8   : > { %v1591_v30 = vcombine.low %v1502_v9, %v1510_v20  ;;  %v1592_v31 = vcombine.high %v1502_v9, %v1510_v20  ;;  %v1607_v32 = vcombine.low %v1506_v2, %v1514_v29  ;;  %v1608_v34 = vcombine.high %v1506_v2, %v1514_v29  ;;  %3632 = vmatprep.mubr.msk.bf16.mxu1 %vm3947_vm2, %v3946_v45 }
 0x6d9   : > { %v2263_v22 = vpack.c.bf16 %v2255_v28, %v2255_v28 }
 0x6da   : > { %v1599_v58 = vrot.slane %v1591_v30, %v4284_v26  ;;  %v1606_v23 = vrot.slane %v1592_v31, %v4284_v26  ;;  %v1615_v36 = vrot.slane %v1607_v32, %v4284_v26  ;;  %v1622_v60 = vrot.slane %v1608_v34, %v4284_v26  ;;  %v3807_v59 = vpop.eup %3806 }
 0x6db   : > { %3627 = vmatmul.mubr.msk.bf16.vlgmr.msra.gmra.mrb[24].mxu0 %vm1803_vm3, %v2263_v22  ;;  %v2256_v5 = vmul.f32 %v3807_v59, %v4468_v50 }
 0x6dc   : > { %v1623_v37 = vcombine.low %v1599_v58, %v1615_v36  ;;  %v1624_v39 = vcombine.high %v1599_v58, %v1615_v36  ;;  %v1639_v40 = vcombine.low %v1606_v23, %v1622_v60  ;;  %v1640_v41 = vcombine.high %v1606_v23, %v1622_v60  ;;  %3638 = vmatprep.mubr.msk.bf16.mxu0 %vm3947_vm2, %v3946_v45 }
 0x6dd   : > { %v2264_v2 = vpack.c.bf16 %v2256_v5, %v2256_v5 }
 0x6de   : > { %v1631_v42 = vrot.slane %v1623_v37, %v4286_v33  ;;  %v1638_v43 = vrot.slane %v1624_v39, %v4286_v33  ;;  %v1647_v8 = vrot.slane %v1639_v40, %v4286_v33  ;;  %v1654_v7 = vrot.slane %v1640_v41, %v4286_v33  ;;  %v3809_v63 = vpop.eup %3808 }
 0x6df   : > { %v2257_v15 = vmul.f32 %v3809_v63, %v4472_v54 }
 0x6e0   : > { %v1727_v44 = vcombine.low %v1631_v42, %v1638_v43  ;;  %v3457_v46 = vcombine.high %v1631_v42, %v1638_v43  ;;  %v1743_v47 = vcombine.low %v1647_v8, %v1654_v7  ;;  %v3458_v10 = vcombine.high %v1647_v8, %v1654_v7 }
 0x6e1   : > { %v2265_v24 = vpack.c.bf16 %v2257_v15, %v2257_v15 }
 0x6e2   : > { %v1734_v25 = vrot.slane %v1727_v44, %v4284_v26  ;;  %v1742_v48 = vrot.slane %v3457_v46, %v4284_v26  ;;  %v1750_v51 = vrot.slane %v1743_v47, %v4284_v26  ;;  %v1758_v52 = vrot.slane %v3458_v10, %v4284_v26 }
 0x6e4   : > { %v1759_v14 = vcombine.low %v1734_v25, %v1742_v48  ;;  %v1775_v55 = vcombine.low %v1750_v51, %v1758_v52  ;;  %v1760_v56 = vcombine.high %v1734_v25, %v1742_v48  ;;  %v1776_v57 = vcombine.high %v1750_v51, %v1758_v52 }
 0x6e6   : > { %v1767_v49 = vrot.slane %v1759_v14, %v4286_v33  ;;  %v1783_v53 = vrot.slane %v1775_v55, %v4286_v33  ;;  %v1774_v61 = vrot.slane %v1760_v56, %v4286_v33  ;;  %v1790_v62 = vrot.slane %v1776_v57, %v4286_v33 }
 0x6e8   : > { %v1791_v0 = vcombine.low %v1767_v49, %v1783_v53  ;;  %v1792_v1 = vcombine.high %v1767_v49, %v1783_v53  ;;  %v1793_v3 = vcombine.low %v1774_v61, %v1790_v62  ;;  %v1794_v4 = vcombine.high %v1774_v61, %v1790_v62 }
 0x6ea   : > { %v1799_v11 = vpack.c.bf16 %v1791_v0, %v1791_v0  ;;  %v1800_v16 = vpack.c.bf16 %v1792_v1, %v1792_v1  ;;  %v1801_v13 = vpack.c.bf16 %v1793_v3, %v1793_v3  ;;  %v1802_v18 = vpack.c.bf16 %v1794_v4, %v1794_v4 }
 0x6ec   : > { %v2457_v12 = vsel %vm2271_vm4, %v1799_v11, 0  ;;  %v2503_v17 = vsel %vm2271_vm4, %v1800_v16, 0  ;;  %v2549_v50 = vsel %vm2271_vm4, %v1801_v13, 0  ;;  %v2595_v54 = vsel %vm2271_vm4, %v1802_v18, 0 }
 0x6ed   : > { %3631 = vmatpush3.bf16.msra.mxu1 %v2457_v12  ;;  %3637 = vmatpush3.bf16.msra.mxu0 %v2503_v17 }
 0x6ee   : > { %3642 = vmatprep.subr.bf16.mxu1 %v3946_v45  ;;  %3648 = vmatprep.subr.bf16.mxu0 %v3946_v45 }
 0x6f0   : > { %3633 = vmatmul.mubr.msk.bf16.vlgmr.msra.gmra.mrb[24].mxu1 %vm1803_vm3, %v2264_v2  ;;  %3639 = vmatmul.mubr.msk.bf16.vlgmr.msra.gmra.mrb[28].mxu0 %vm1803_vm3, %v2265_v24 }
 0x6f1   : > { %3643 = vmatpush3.bf16.msra.mxu1 %v2549_v50  ;;  %3649 = vmatpush3.bf16.msra.mxu0 %v2595_v54 }
 0x6f2   : > { %3644 = vmatprep.mubr.msk.bf16.mxu1 %vm3947_vm2, %v3946_v45  ;;  %3650 = vmatprep.mubr.msk.bf16.mxu0 %vm3947_vm2, %v3946_v45 }
 0x6f3   : > { %3654 = vmatprep.subr.bf16.mxu1 %v3946_v45  ;;  %3662 = vmatprep.subr.bf16.mxu0 %v3946_v45 }
 0x708   : > { %v2240_v6 = vpop.xlane.xlu0 %2239  ;;  %v2243_v19 = vpop.xlane.xlu1 %2242 }
 0x709   : > { %3810 = vrcp.f32 %v2240_v6 }
 0x70a   : > { %3812 = vrcp.f32 %v2243_v19 }
 0x713   : > { %v3811_v20 = vpop.eup %3810 }
 0x714   : > { %v3813_v21 = vpop.eup %3812  ;;  %v2258_v27 = vmul.f32 %v3811_v20, %v4494_v35 }
 0x715   : > { %v2259_v28 = vmul.f32 %v3813_v21, %v4496_v38 }
 0x716   : > { %v2266_v9 = vpack.c.bf16 %v2258_v27, %v2258_v27 }
 0x717   : > { %v2267_v29 = vpack.c.bf16 %v2259_v28, %v2259_v28 }
 0x718   : > { %3645 = vmatmul.mubr.msk.bf16.vlgmr.msra.gmra.mrb[28].mxu1 %vm1803_vm3, %v2266_v9 }
 0x719   : > { %3651 = vmatmul.mubr.msk.bf16.vlgmr.msra.gmra.mrb[32].mxu0 %vm1803_vm3, %v2267_v29  ;;  %3658 = vmatprep.mubr.msk.bf16.mxu1 %vm3947_vm2, %v3946_v45 }
 0x71a   : > { %3666 = vmatprep.mubr.msk.bf16.mxu0 %vm3947_vm2, %v3946_v45 }
 0x79f   : > { %v2309_v30 = vpop.f32.mrb[16].mxu1 }
 0x7a0   : > { %v3610_v32 = vpop.f32.mrb[17].mxu1 }
 0x7a1   : > { %v2355_v31 = vpop.f32.mrb[20].mxu0  ;;  %v2312_v22 = vpop.f32.mrb[18].mxu1 }
 0x7a2   : > { %v3616_v34 = vpop.f32.mrb[21].mxu0  ;;  %v3611_v58 = vpop.f32.mrb[19].mxu1 }
 0x7a3   : > { %v2358_v35 = vpop.f32.mrb[22].mxu0 }
 0x7a4   : > { %v3617_v38 = vpop.f32.mrb[23].mxu0 }
 0x7aa   : > { %v2401_v23 = vpop.f32.mrb[20].mxu1 }
 0x7ab   : > { %v2637_v36 = vcombine.low %v2309_v30, %v2401_v23  ;;  %v2638_v60 = vcombine.high %v2309_v30, %v2401_v23  ;;  %v3622_v37 = vpop.f32.mrb[21].mxu1 }
 0x7ac   : > { %v2404_v39 = vpop.f32.mrb[22].mxu1 }
 0x7ad   : > { %v3623_v40 = vpop.f32.mrb[23].mxu1  ;;  %v2645_v44 = vrot.slane %v2637_v36, %v4284_v26  ;;  %v2652_v46 = vrot.slane %v2638_v60, %v4284_v26 }
 0x7ae   : > { %v2447_v41 = vpop.f32.mrb[24].mxu0 }
 0x7af   : > { %v2653_v42 = vcombine.low %v2355_v31, %v2447_v41  ;;  %v2654_v43 = vcombine.high %v2355_v31, %v2447_v41  ;;  %v3628_v8 = vpop.f32.mrb[25].mxu0 }
 0x7b0   : > { %v2450_v7 = vpop.f32.mrb[26].mxu0 }
 0x7b1   : > { %v2661_v47 = vrot.slane %v2653_v42, %v4284_v26  ;;  %v2668_v10 = vrot.slane %v2654_v43, %v4284_v26  ;;  %v3629_v25 = vpop.f32.mrb[27].mxu0 }
 0x7b3   : > { %v2669_v48 = vcombine.low %v2645_v44, %v2661_v47  ;;  %v2670_v51 = vcombine.high %v2645_v44, %v2661_v47  ;;  %v2685_v52 = vcombine.low %v2652_v46, %v2668_v10  ;;  %v2686_v14 = vcombine.high %v2652_v46, %v2668_v10 }
 0x7b5   : > { %v2677_v55 = vrot.slane %v2669_v48, %v4286_v33  ;;  %v2684_v56 = vrot.slane %v2670_v51, %v4286_v33  ;;  %v2693_v57 = vrot.slane %v2685_v52, %v4286_v33  ;;  %v2700_v59 = vrot.slane %v2686_v14, %v4286_v33  ;;  %v3770_v14 = vld [vmem:[%s4164_s23] sm:$0xff]  }
 0x7b6   : > { %3655 = vmatpush3.bf16.msra.mxu1 %v3770_v14 }
 0x7b7   : > { %v2773_v49 = vcombine.low %v2677_v55, %v2684_v56  ;;  %v3475_v53 = vcombine.high %v2677_v55, %v2684_v56  ;;  %v2789_v61 = vcombine.low %v2693_v57, %v2700_v59  ;;  %v3476_v62 = vcombine.high %v2693_v57, %v2700_v59  ;;  %3656 = vmatprep.subr.bf16.mxu1 %v3946_v45 }
 0x7b9   : > { %v2780_v63 = vrot.slane %v2773_v49, %v4284_v26  ;;  %v2788_v0 = vrot.slane %v3475_v53, %v4284_v26  ;;  %v2796_v1 = vrot.slane %v2789_v61, %v4284_v26  ;;  %v2804_v3 = vrot.slane %v3476_v62, %v4284_v26 }
 0x7bb   : > { %v2806_v4 = vcombine.high %v2780_v63, %v2788_v0  ;;  %v2822_v5 = vcombine.high %v2796_v1, %v2804_v3  ;;  %v2805_v15 = vcombine.low %v2780_v63, %v2788_v0  ;;  %v2821_v11 = vcombine.low %v2796_v1, %v2804_v3 }
 0x7bd   : > { %v4587_v16 = vrot.slane %v2806_v4, %v4286_v33  ;;  %v4590_v12 = vrot.slane %v2822_v5, %v4286_v33  ;;  %v4593_v17 = vrot.slane %v2805_v15, %v4286_v33  ;;  %v4596_v13 = vrot.slane %v2821_v11, %v4286_v33  ;;  %v3771_v4 = vld [vmem:[%s4164_s23 + $0x8] sm:$0xff]  }
 0x7be   : > { %3657 = vmatpush3.bf16.msra.mxu1 %v3771_v4 }
 0x7bf   : > { %v2839_v18 = vcombine.low %v4587_v16, %v4590_v12  ;;  %v2837_v2 = vcombine.low %v4593_v17, %v4596_v13  ;;  %v2838_v24 = vcombine.high %v4593_v17, %v4596_v13  ;;  %v2840_v50 = vcombine.high %v4587_v16, %v4590_v12  ;;  %3670 = vmatprep.subr.bf16.mxu1 %v3946_v45  ;;  %v3479_v17 = vld [vmem:[%s4773_s29] ss:$0 sm:$0xff] }
 0x7c3   : > { %v2493_v54 = vpop.f32.mrb[24].mxu1  ;;  %v2539_v6 = vpop.f32.mrb[28].mxu0 }
 0x7c4   : > { %v3634_v19 = vpop.f32.mrb[25].mxu1  ;;  %v3640_v20 = vpop.f32.mrb[29].mxu0 }
 0x7c5   : > { %v2496_v21 = vpop.f32.mrb[26].mxu1  ;;  %v2542_v27 = vpop.f32.mrb[30].mxu0 }
 0x7c6   : > { %v3635_v28 = vpop.f32.mrb[27].mxu1  ;;  %v3641_v9 = vpop.f32.mrb[31].mxu0 }
 0x7eb   : > { %v2585_v29 = vpop.f32.mrb[28].mxu1 }
 0x7ec   : > { %v2705_v30 = vcombine.low %v2493_v54, %v2585_v29  ;;  %v2706_v31 = vcombine.high %v2493_v54, %v2585_v29  ;;  %v2631_v32 = vpop.f32.mrb[32].mxu0  ;;  %v3646_v34 = vpop.f32.mrb[29].mxu1 }
 0x7ed   : > { %v2721_v22 = vcombine.low %v2539_v6, %v2631_v32  ;;  %v2722_v35 = vcombine.high %v2539_v6, %v2631_v32  ;;  %v3652_v58 = vpop.f32.mrb[33].mxu0  ;;  %v2588_v38 = vpop.f32.mrb[30].mxu1 }
 0x7ee   : > { %v2713_v23 = vrot.slane %v2705_v30, %v4284_v26  ;;  %v2720_v36 = vrot.slane %v2706_v31, %v4284_v26  ;;  %v2634_v60 = vpop.f32.mrb[34].mxu0  ;;  %v3647_v37 = vpop.f32.mrb[31].mxu1  ;;  %v3822_v58 = vld [vmem:[#allocation2] sm:$0xff] }
 0x7ef   : > { %v2729_v39 = vrot.slane %v2721_v22, %v4284_v26  ;;  %v2736_v40 = vrot.slane %v2722_v35, %v4284_v26  ;;  %v3653_v41 = vpop.f32.mrb[35].mxu0  ;;  %v3823_v60 = vld [vmem:[#allocation2 + $0x8] sm:$0xff] }
 0x7f1   : > { %v2737_v42 = vcombine.low %v2713_v23, %v2729_v39  ;;  %v2738_v43 = vcombine.high %v2713_v23, %v2729_v39  ;;  %v2753_v8 = vcombine.low %v2720_v36, %v2736_v40  ;;  %v2754_v7 = vcombine.high %v2720_v36, %v2736_v40 }
 0x7f3   : > { %v2745_v44 = vrot.slane %v2737_v42, %v4286_v33  ;;  %v2752_v46 = vrot.slane %v2738_v43, %v4286_v33  ;;  %v2761_v47 = vrot.slane %v2753_v8, %v4286_v33  ;;  %v2768_v10 = vrot.slane %v2754_v7, %v4286_v33 }
 0x7f5   : > { %v2841_v25 = vcombine.low %v2745_v44, %v2752_v46  ;;  %v3477_v48 = vcombine.high %v2745_v44, %v2752_v46  ;;  %v2857_v51 = vcombine.low %v2761_v47, %v2768_v10  ;;  %v3478_v52 = vcombine.high %v2761_v47, %v2768_v10 }
 0x7f7   : > { %v2848_v55 = vrot.slane %v2841_v25, %v4284_v26  ;;  %v2856_v56 = vrot.slane %v3477_v48, %v4284_v26  ;;  %v2864_v57 = vrot.slane %v2857_v51, %v4284_v26  ;;  %v2872_v59 = vrot.slane %v3478_v52, %v4284_v26  ;;  %v3772_v48 = vld [vmem:[%s4181_s2] sm:$0xff]   ;;  %v3773_v51 = vld [vmem:[%s4181_s2 + $0x8] sm:$0xff]  }
 0x7f8   : > { %3663 = vmatpush3.bf16.msra.mxu0 %v3772_v48 }
 0x7f9   : > { %v2874_v49 = vcombine.high %v2848_v55, %v2856_v56  ;;  %v2890_v53 = vcombine.high %v2864_v57, %v2872_v59  ;;  %v2873_v61 = vcombine.low %v2848_v55, %v2856_v56  ;;  %v2889_v62 = vcombine.low %v2864_v57, %v2872_v59  ;;  %3664 = vmatprep.subr.bf16.mxu0 %v3946_v45 }
 0x7fb   : > { %v2888_v63 = vrot.slane %v2874_v49, %v4286_v33  ;;  %v2904_v0 = vrot.slane %v2890_v53, %v4286_v33  ;;  %v2881_v1 = vrot.slane %v2873_v61, %v4286_v33  ;;  %v2897_v3 = vrot.slane %v2889_v62, %v4286_v33  ;;  %v3483_v61 = vld [vmem:[%s687_s0] ss:$0 sm:$0xff] }
 0x7fc   : > { %3665 = vmatpush3.bf16.msra.mxu0 %v3773_v51 }
 0x7fd   : > { %v2907_v5 = vcombine.low %v2888_v63, %v2904_v0  ;;  %v2906_v15 = vcombine.high %v2881_v1, %v2897_v3  ;;  %v2905_v11 = vcombine.low %v2881_v1, %v2897_v3  ;;  %v2908_v26 = vcombine.high %v2888_v63, %v2904_v0  ;;  %v3484_v1 = vld [vmem:[%s690_s25] ss:$0 sm:$0xff] }
 0x7ff   : > { %v3758_v16 = vpack.i.bf16 %v2907_v5, %v2839_v18  ;;  %v3753_v12 = vpack.i.bf16 %v2906_v15, %v2838_v24  ;;  %v3763_v54 = vpack.i.bf16 %v2908_v26, %v2840_v50  ;;  %v3775_v26 = vld [vmem:[%s4191_s21 + $0x8] sm:$0xff]  }
 0x801   : > { %3759 = vrot.lane.b32.xlu1 %v3758_v16, %s3955_s26  ;;  %3754 = vrot.lane.b32.xlu0 %v3753_v12, %s3956_s1  ;;  %v3776_v16 = vld [vmem:[%s4191_s21 + $0x10] sm:$0xff]   ;;  %v3777_v12 = vld [vmem:[%s4191_s21 + $0x18] sm:$0xff]  }
 0x805   : > { %3764 = vrot.lane.b32.xlu0 %v3763_v54, %s3957_s20  ;;  %v3485_v54 = vld [vmem:[%s698_s5] ss:$0 sm:$0xff] }
 0x873   : > { %v3760_v6 = vpop.permute.xlu1 %3759  ;;  %v3755_v33 = vpop.permute.xlu0 %3754 }
 0x874   : > { %v3757_v19 = vunpack.i.h.bf16 %v3755_v33  ;;  %v3756_v20 = vunpack.i.l.bf16 %v3755_v33  ;;  %v3762_v21 = vunpack.i.h.bf16 %v3760_v6  ;;  %v3761_v27 = vunpack.i.l.bf16 %v3760_v6 }
 0x876   : > { %v2933_v18 = vsel %vm1803_vm3, %v2837_v2, %v3756_v20  ;;  %v2934_v24 = vsel %vm1803_vm3, %v2905_v11, %v3757_v19  ;;  %v3774_v11 = vld [vmem:[%s4191_s21] sm:$0xff]  }
 0x877   : > { %v3765_v50 = vpop.permute.xlu0 %3764  ;;  %v2936_v29 = vsel %vm2935_vm5, %v2933_v18, %v3761_v27  ;;  %v2937_v30 = vsel %vm2935_vm5, %v2934_v24, %v3762_v21 }
 0x878   : > { %v3767_v28 = vunpack.i.h.bf16 %v3765_v50  ;;  %v3766_v9 = vunpack.i.l.bf16 %v3765_v50 }
 0x87a   : > { %v2939_v31 = vsel %vm2938_vm6, %v2936_v29, %v3766_v9  ;;  %v2940_v32 = vsel %vm2938_vm6, %v2937_v30, %v3767_v28 }
 0x87b   : > { %v2941_v34 = vpack.c.bf16 %v2940_v32, %v2939_v31 }
 0x87d   : > { %3659 = vmatmul.mubr.msk.bf16.vlgmr.msra.gmra.mrb[32].mxu1 %vm767_vm1, %v2941_v34 }
 0x87e   : > { %3678 = vmatprep.mubr.msk.bf16.mxu1 %vm3947_vm2, %v3946_v45  ;;  %3671 = vmatpush3.bf16.msra.mxu1 %v3774_v11 }
 0x87f   : > { %3672 = vmatprep.subr.bf16.mxu1 %v3946_v45 }
 0x882   : > { %3673 = vmatpush3.bf16.msra.mxu1 %v3775_v26 }
 0x883   : > { %3674 = vmatprep.subr.bf16.mxu1 %v3946_v45 }
 0x886   : > { %3675 = vmatpush3.bf16.msra.mxu1 %v3776_v16 }
 0x887   : > { %3676 = vmatprep.subr.bf16.mxu1 %v3946_v45 }
 0x88a   : > { %3677 = vmatpush3.bf16.msra.mxu1 %v3777_v12 }
 0x950   : > { %v3002_v13 = vpop.f32.mrb[32].mxu1 }
 0x951   : > { %v3003_v2 = vadd.f32 %v3479_v17, %v3002_v13  ;;  %v3660_v22 = vpop.f32.mrb[33].mxu1 }
 0x952   : > { %v3005_v35 = vpop.f32.mrb[34].mxu1 }
 0x953   : > { %v4640_v38 = vadd.f32 %v3822_v58, %v3003_v2  ;;  %v3006_v23 = vadd.f32 %v3479_v17, %v3005_v35  ;;  %v3661_v36 = vpop.f32.mrb[35].mxu1  ;;  %v3489_v17 = vld [vmem:[%s706_s16] ss:$0 sm:$0xff] }
 0x955   : > { %v4642_v37 = vadd.f32 %v3823_v60, %v3006_v23  ;;  %v3013_v39 = vsel %vm767_vm1, %v4640_v38, 0.0 }
 0x956   : > { %3014 = vadd.xlane.f32.xlu1 %v3013_v39 }
 0x957   : > { %v3016_v40 = vsel %vm767_vm1, %v4642_v37, 0.0 }
 0x958   : > { %3017 = vadd.xlane.f32.xlu0 %v3016_v40 }
 0x9e3   : > { %v3015_v41 = vpop.xlane.xlu1 %3014 }
 0x9e4   : > { %v3019_v42 = vmul.f32 0.03125, %v3015_v41 }
 0x9e5   : > { %v3018_v43 = vpop.xlane.xlu0 %3017 }
 0x9e6   : > { %v3021_v8 = vsub.f32 %v4640_v38, %v3019_v42  ;;  %v3020_v7 = vmul.f32 0.03125, %v3018_v43 }
 0x9e8   : > { %v3022_v44 = vsub.f32 %v4642_v37, %v3020_v7  ;;  %v3023_v46 = vmul.f32 %v3021_v8, %v3021_v8 }
 0x9ea   : > { %v3025_v47 = vsel %vm767_vm1, %v3023_v46, 0.0  ;;  %v3024_v10 = vmul.f32 %v3022_v44, %v3022_v44 }
 0x9eb   : > { %3026 = vadd.xlane.f32.xlu0 %v3025_v47 }
 0x9ec   : > { %v3028_v25 = vsel %vm767_vm1, %v3024_v10, 0.0 }
 0x9ef   : > { %3029 = vadd.xlane.f32.xlu0 %v3028_v25 }
 0xa78   : > { %v3027_v52 = vpop.xlane.xlu0 %3026 }
 0xa79   : > { %v3031_v14 = vmul.f32 0.03125, %v3027_v52 }
 0xa7b   : > { %v3033_v55 = vadd.f32 1e-05, %v3031_v14 }
 0xa7c   : > { %v3030_v56 = vpop.xlane.xlu0 %3029 }
 0xa7d   : > { %3814 = vrsqrt.f32 %v3033_v55  ;;  %v3032_v57 = vmul.f32 0.03125, %v3030_v56 }
 0xa7f   : > { %v3034_v59 = vadd.f32 1e-05, %v3032_v57 }
 0xa81   : > { %3816 = vrsqrt.f32 %v3034_v59 }
 0xa87   : > { %v3815_v49 = vpop.eup %3814 }
 0xa88   : > { %v3037_v53 = vmul.f32 %v3815_v49, %v3021_v8 }
 0xa8a   : > { %v3045_v63 = vmul.f32 %v3483_v61, %v3037_v53 }
 0xa8b   : > { %v3817_v62 = vpop.eup %3816 }
 0xa8c   : > { %v3038_v0 = vmul.f32 %v3817_v62, %v3022_v44  ;;  %v3053_v4 = vadd.f32 %v3484_v1, %v3045_v63 }
 0xa8e   : > { %v3046_v3 = vmul.f32 %v3483_v61, %v3038_v0 }
 0xa90   : > { %v3054_v5 = vadd.f32 %v3484_v1, %v3046_v3 }
 0xa92   : > { %v3055_v15 = vpack.c.bf16 %v3054_v5, %v3053_v4 }
 0xa94   : > { %3667 = vmatmul.mubr.msk.bf16.vlgmr.msra.gmra.mrb[36].mxu0 %vm767_vm1, %v3055_v15 }
 0xb67   : > { %v3116_v6 = vpop.f32.mrb[36].mxu0 }
 0xb68   : > { %v3117_v33 = vadd.f32 %v3485_v54, %v3116_v6  ;;  %v3668_v19 = vpop.f32.mrb[37].mxu0 }
 0xb69   : > { %v3119_v20 = vpop.f32.mrb[38].mxu0 }
 0xb6a   : > { %v3125_v21 = vmul.f32 0.70710677, %v3117_v33  ;;  %v3120_v27 = vadd.f32 %v3485_v54, %v3119_v20  ;;  %v3669_v18 = vpop.f32.mrb[39].mxu0  ;;  %v3123_v9 = vmul.f32 0.5, %v3117_v33 }
 0xb6c   : > { %3818 = verf.f32 %v3125_v21  ;;  %v3126_v24 = vmul.f32 0.70710677, %v3120_v27  ;;  %v3124_v29 = vmul.f32 0.5, %v3120_v27 }
 0xb6e   : > { %3820 = verf.f32 %v3126_v24 }
 0xb76   : > { %v3819_v50 = vpop.eup %3818 }
 0xb77   : > { %v3129_v28 = vadd.f32 1.0, %v3819_v50 }
 0xb78   : > { %v3821_v45 = vpop.eup %3820 }
 0xb79   : > { %v3130_v30 = vadd.f32 1.0, %v3821_v45  ;;  %v3131_v31 = vmul.f32 %v3129_v28, %v3123_v9 }
 0xb7b   : > { %v3132_v32 = vmul.f32 %v3130_v30, %v3124_v29 }
 0xb7d   : > { %v3133_v34 = vpack.c.bf16 %v3132_v32, %v3131_v31 }
 0xb7f   : > { %3679 = vmatmul.mubr.msk.bf16.vlgmr.msra.gmra.mrb[36].mxu1 %vm3173_vm7, %v3133_v34 }
 0xc52   : > { %v3211_v13 = vpop.f32.mrb[36].mxu1 }
 0xc53   : > { %v3212_v2 = vadd.f32 %v3489_v17, %v3211_v13  ;;  %v3680_v22 = vpop.f32.mrb[37].mxu1  ;;  %3225 = sbr.rel (%p3495_p4) target bundleno = 3162 (0xc5a), region = 96 }
 0xc54   : > { %v3214_v35 = vpop.f32.mrb[38].mxu1 }
 0xc55   : > { %v3218_v58 = vadd.f32 %v3212_v2, %v4640_v38  ;;  %v3215_v23 = vadd.f32 %v3489_v17, %v3214_v35  ;;  %v3681_v36 = vpop.f32.mrb[39].mxu1 }
 0xc57   : > { %3220 = vst.msk [vmem:[#allocation2] sm:$0xff] %vm767_vm1, %v3218_v58  ;;  %v3219_v60 = vadd.f32 %v3215_v23, %v4642_v37  ;;  %3226 = vst.msk [vmem:[#allocation8] sm:$0xff] (!%p3495_p4), %vm767_vm1, %v3218_v58 }
 0xc59   : > { %3221 = vst.msk [vmem:[#allocation2 + $0x8] sm:$0xff] %vm767_vm1, %v3219_v60  ;;  %3227 = vst.msk [vmem:[#allocation8 + $0x8] sm:$0xff] (!%p3495_p4), %vm767_vm1, %v3219_v60 }
 0xc5a PF: > { %s4774_s27 = sld [smem:[#allocation13_spill]]  ;;  %s3958_s17 = smov [#allocation8]  }
 0xc5b   : > { %s3237_s15 = sshll.u32 %s3958_s17, 4  ;;  %s3238_s15 = int_to_ptr.vmem [resolvable:$true] %s3237_s15 }
 0xc5c   : > { %s3880_s28 = scalar_lea.vmem %s3238_s15, 256  ;;  %p3887_p13 = scmp.lt.s32.totalorder %s3238_s15, %s3238_s15 }
 0xc5d   : > { %p3881_p10 = scmp.ne.s32.totalorder %s3238_s15, %s3880_s28  ;;  %p3888_p0 = scmp.lt.s32.totalorder %s3880_s28, %s3880_s28 }
 0xc5f   : > { %p3889_p1 = por %p3888_p0, %p3887_p13 }
 0xc60   : > { %s4775_s16 = sadd.s32 4294967295, %s4774_s27  }
 0xc61   : > { %p4692_p9 = scmp.eq.s32.totalorder %s4775_s16, 1 }
 0xc63   : > { %p3882_p11 = pnand %p3881_p10, %p4692_p9 }
 0xc65   : > { %p3883_p12 = pneg %p3882_p11 }
 0xc67   : > { %p3890_p2 = pnand %p3889_p1, %p3883_p12 }
 0xc69   : > { %3893 = shalt.err (!%p3890_p2)
}
 0xc6a   : > { %s4777_s20 = sld [smem:[#allocation20_spill]] }
 0xc70   : > { %s4778_s23 = smov %s4777_s20  ;;  %s3894_s24 = scalar_lea.hbm %s4777_s20, 256 }
 0xc71   : > { %p3895_p5 = scmp.ne.s32.totalorder %s4778_s23, %s3894_s24  ;;  %p3900_p3 = scmp.lt.u32.totalorder %s3894_s24, %s4778_s23 }
 0xc73   : > { %p3896_p7 = pnand %p3895_p5, %p4692_p9 }
 0xc75   : > { %p3897_p8 = pneg %p3896_p7 }
 0xc77   : > { %p3902_p6 = pnand %p3900_p3, %p3897_p8 }
 0xc79   : > { %3905 = shalt.err (!%p3902_p6)
}
 0xc7a   : > { %s3959_s7 = smov 128  }
 0xc7b   : > { %3691 = dma.vmem_to_hbm [thread:$0]  (%p4692_p9), %s3238_s15, 256, %s4778_s23, [#allocation5], %s3959_s7, %s3959_s7, %s3956_s1  }
 0xc7c   : > { %3927 = dma.done.wait (%p4692_p9), [#allocation5], 256  }
 0xc7d   : > { %3929 = vsyncadd (%p4692_p9), [#allocation5], 4294967040 }
 0xc7e PF: > { %s4779_s5 = sld [smem:[#allocation13_spill]]  ;;  %s4780_s18 = sld [smem:[#allocation12_spill]] }
 0xc7f   : > { %s4781_s19 = sld [smem:[#allocation14_spill]] }
 0xc84   : > { %s28_s20 = sadd.s32 1, %s4779_s5  }
 0xc85   : > { %p25_p4 = scmp.ge.s32.totalorder %s28_s20, 4  }
 0xc87   :  { %27 = sbr.rel (!%p25_p4) target bundleno = 11 (0xb), region = 159 }
 0xc8e   :  { %3253 = vsyncpa [#allocation4], 1 }
 0xc8f   :  { %3255 = vsyncpa [#allocation4 + $0x1], 1 }
 0xc90   :  { %3256 = vsyncpa [#allocation7], 1 }
 0xc91   :  { %3257 = vsyncpa [#allocation5], 1 }
 0xc92   :  { %3259 = vsyncpa [#allocation5 + $0x1], 1 }

</bundles_post_ra>
